<compile_context>
chip_gen: v7x
topology: tpu7x:2x2x1
jax: 0.10.0
libtpu: 0.0.40
codegen_flags: <defaults>
</compile_context>

<pallas_src>
import math

import jax
import jax.numpy as jnp
import numpy as np
from jax import lax
from jax.experimental import pallas as pl
from jax.experimental.pallas import tpu as pltpu

D_MODEL = 32
D_FFN = 64
N_HEADS = 4
HEAD_DIM = D_MODEL // N_HEADS
LANE = 128  # lane width used for the packed weight slabs

# ---------------------------------------------------------------------------
# Packed-weight layout (static, computed at import time).
# Matrix slab: each pre-transposed (in, out) matrix occupies `rows` sublanes starting at a
# 32-multiple row offset, columns 0:cols (zero-padded to 128 lanes).
# Vector slab: one parameter vector per row, columns 0:cols.
# ---------------------------------------------------------------------------


def _build_mat_layout():
    layout = [
        ("sa_qk", D_MODEL, 2 * D_MODEL),   # [Wq^T * scale | Wk^T] for self-attention
        ("sa_v",  D_MODEL, D_MODEL),
        ("sa_o",  D_MODEL, D_MODEL),
        ("ca_q",  D_MODEL, D_MODEL),       # Wq^T * scale for cross-attention
        ("ca_kv", D_MODEL, 2 * D_MODEL),   # [Wk^T | Wv^T] for cross-attention
        ("ca_o",  D_MODEL, D_MODEL),
        ("l1",    D_MODEL, D_FFN),
        ("l2",    D_FFN,   D_MODEL),
    ]
    offs, r = {}, 0
    for name, rows, cols in layout:
        offs[name] = (r, rows, cols)
        r += rows
    return offs, ((r + 7) // 8) * 8


def _build_vec_layout():
    layout = [
        ("sa_qk_b", 2 * D_MODEL), ("sa_v_b", D_MODEL), ("sa_o_b", D_MODEL),
        ("ca_q_b", D_MODEL), ("ca_kv_b", 2 * D_MODEL), ("ca_o_b", D_MODEL),
        ("l1_b", D_FFN), ("l2_b", D_MODEL),
        ("n1_w", D_MODEL), ("n1_b", D_MODEL),
        ("n2_w", D_MODEL), ("n2_b", D_MODEL),
        ("n3_w", D_MODEL), ("n3_b", D_MODEL),
    ]
    offs = {name: (i, cols) for i, (name, cols) in enumerate(layout)}
    return offs, ((len(layout) + 7) // 8) * 8


MAT_OFFS, MAT_ROWS_PAD = _build_mat_layout()
VEC_OFFS, VEC_ROWS_PAD = _build_vec_layout()


def pack_params(params):
    """Fuse / pre-transpose / scale-fold the PyTorch-style params into two lane-padded slabs."""
    scale = 1.0 / math.sqrt(HEAD_DIM)
    p = {k: np.asarray(v, np.float32) for k, v in params.items()}

    mats = {
        "sa_qk": np.concatenate([p["sa_wq"].T * scale, p["sa_wk"].T], axis=1),
        "sa_v":  p["sa_wv"].T,
        "sa_o":  p["sa_wo"].T,
        "ca_q":  p["ca_wq"].T * scale,
        "ca_kv": np.concatenate([p["ca_wk"].T, p["ca_wv"].T], axis=1),
        "ca_o":  p["ca_wo"].T,
        "l1":    p["l1_w"].T,
        "l2":    p["l2_w"].T,
    }
    vecs = {
        "sa_qk_b": np.concatenate([p["sa_bq"] * scale, p["sa_bk"]], axis=1),
        "sa_v_b":  p["sa_bv"],
        "sa_o_b":  p["sa_bo"],
        "ca_q_b":  p["ca_bq"] * scale,
        "ca_kv_b": np.concatenate([p["ca_bk"], p["ca_bv"]], axis=1),
        "ca_o_b":  p["ca_bo"],
        "l1_b":    p["l1_b"],
        "l2_b":    p["l2_b"],
        "n1_w": p["n1_w"], "n1_b": p["n1_b"],
        "n2_w": p["n2_w"], "n2_b": p["n2_b"],
        "n3_w": p["n3_w"], "n3_b": p["n3_b"],
    }

    wmat = np.zeros((MAT_ROWS_PAD, LANE), np.float32)
    for name, (r0, rows, cols) in MAT_OFFS.items():
        wmat[r0:r0 + rows, :cols] = mats[name]

    wvec = np.zeros((VEC_ROWS_PAD, LANE), np.float32)
    for name, (i, cols) in VEC_OFFS.items():
        wvec[i, :cols] = vecs[name][0]

    return jnp.asarray(wmat), jnp.asarray(wvec)


# ---------------------------------------------------------------------------
# Kernel
# ---------------------------------------------------------------------------


def decoder_layer_kernel(tgt_ref, pos_ref, src_ref, mb_ref, wmat_ref, wvec_ref, out_ref):
    Bt, Lq, D = tgt_ref.shape
    Lk = src_ref.shape[1]
    H, hd = N_HEADS, HEAD_DIM

    def mat(name):
        r0, rows, cols = MAT_OFFS[name]
        return wmat_ref[r0:r0 + rows, :cols]          # pre-transposed (in, out)

    vec_all = wvec_ref[...]                           # (16, 128): 2 vregs, load once

    def vec(name):
        i, cols = VEC_OFFS[name]
        return vec_all[i:i + 1, :cols]                # (1, cols), broadcasts over rows

    def flat(ref):                                    # (Bt, L, D) ref -> (Bt*L, D) value
        if Bt == 1:
            return ref[0]
        return jnp.concatenate([ref[i] for i in range(Bt)], axis=0)

    def split_heads(x2d, col0):                       # take D cols at col0 -> (H, L, hd)
        return jnp.stack(
            [x2d[:, col0 + h * hd:col0 + (h + 1) * hd] for h in range(H)], axis=0)

    def merge_heads(o):                               # (H, Lq, hd) -> (Lq, D)
        return jnp.concatenate([o[h] for h in range(H)], axis=-1)

    def attend(qh, kh, vh, bias):
        # qh already carries the 1/sqrt(head_dim) scale (folded into the Q weights host-side).
        s = jnp.einsum('hqd,hkd->hqk', qh, kh, preferred_element_type=jnp.float32)
        if bias is not None:
            s = s + bias                              # (1, Lk) broadcast over (H, Lq, Lk)
        s = s - jnp.max(s, axis=-1, keepdims=True)
        p = jnp.exp(s)
        # one reciprocal per (head, query) row, then a multiply (instead of Lk divides)
        p = p * pl.reciprocal(jnp.sum(p, axis=-1, keepdims=True), approx=False)
        o = jnp.einsum('hqk,hkd->hqd', p, vh, preferred_element_type=jnp.float32)
        return merge_heads(o)

    def layer_norm(x, wn, bn, eps=1e-5):
        m = jnp.mean(x, axis=-1, keepdims=True)
        v = jnp.mean((x - m) ** 2, axis=-1, keepdims=True)
        return (x - m) * lax.rsqrt(v + eps) * wn + bn

    tgt = flat(tgt_ref)                               # (Bt*Lq, D)
    pos = flat(pos_ref)                               # (Bt*Lq, D)
    src = flat(src_ref)                               # (Bt*Lk, D)

    # --- self attention (q = k = tgt + pos, v = tgt, no mask) ---
    qk_in = tgt + pos
    qk = jnp.dot(qk_in, mat("sa_qk"), preferred_element_type=jnp.float32) + vec("sa_qk_b")
    vp = jnp.dot(tgt, mat("sa_v"), preferred_element_type=jnp.float32) + vec("sa_v_b")
    rows = []
    for bi in range(Bt):
        qs = qk[bi * Lq:(bi + 1) * Lq, :]
        vs = vp[bi * Lq:(bi + 1) * Lq, :]
        rows.append(attend(split_heads(qs, 0), split_heads(qs, D), split_heads(vs, 0), None))
    attn = rows[0] if Bt == 1 else jnp.concatenate(rows, axis=0)
    t2 = jnp.dot(attn, mat("sa_o"), preferred_element_type=jnp.float32) + vec("sa_o_b")
    tgt = layer_norm(tgt + t2, vec("n2_w"), vec("n2_b"))   # dropout2 is identity (eval mode)

    # --- cross attention (q = tgt + pos, k = v = src, key_padding_mask) ---
    q_in = tgt + pos
    qp = jnp.dot(q_in, mat("ca_q"), preferred_element_type=jnp.float32) + vec("ca_q_b")
    kv = jnp.dot(src, mat("ca_kv"), preferred_element_type=jnp.float32) + vec("ca_kv_b")
    rows = []
    for bi in range(Bt):
        qs = qp[bi * Lq:(bi + 1) * Lq, :]
        ks = kv[bi * Lk:(bi + 1) * Lk, :]
        rows.append(attend(split_heads(qs, 0), split_heads(ks, 0), split_heads(ks, D),
                           mb_ref[bi]))
    attn = rows[0] if Bt == 1 else jnp.concatenate(rows, axis=0)
    t2 = jnp.dot(attn, mat("ca_o"), preferred_element_type=jnp.float32) + vec("ca_o_b")
    tgt = layer_norm(tgt + t2, vec("n1_w"), vec("n1_b"))   # dropout1 is identity

    # --- FFN: linear1 -> relu -> linear2, residual, norm3 ---
    h1 = jnp.maximum(
        jnp.dot(tgt, mat("l1"), preferred_element_type=jnp.float32) + vec("l1_b"), 0.0)
    t2 = jnp.dot(h1, mat("l2"), preferred_element_type=jnp.float32) + vec("l2_b")
    tgt = layer_norm(tgt + t2, vec("n3_w"), vec("n3_b"))   # dropout3/4 are identity

    for bi in range(Bt):
        out_ref[bi] = tgt[bi * Lq:(bi + 1) * Lq, :]


# ---------------------------------------------------------------------------
# Wrapper
# ---------------------------------------------------------------------------


def detr_decoder_layer(tgt, pos, src, mask, params, batch_block=None):
    B, Lq, D = tgt.shape
    _, Lk, _ = src.shape
    assert D == D_MODEL

    # Keep >= 2 parallel grid steps (both v7x TensorCores get work), while blocking larger B into
    # Bt elements per step so per-step pipeline overhead is amortized and matmul M grows to Bt*Lq.
    if batch_block is None:
        batch_block = B // 2 if (B >= 2 and B % 2 == 0) else B
    assert B % batch_block == 0
    n_steps = B // batch_block

    # Additive key-padding bias: 0 where valid, large negative where padded.
    mask_bias = jnp.where(mask, 0.0, -1e30).astype(jnp.float32).reshape(B, 1, Lk)
    wmat, wvec = pack_params(params)

    per_batch3 = lambda shape: pl.BlockSpec((batch_block,) + tuple(shape[1:]),
                                            lambda b: (b, 0, 0))

    return pl.pallas_call(
        decoder_layer_kernel,
        out_shape=jax.ShapeDtypeStruct((B, Lq, D), jnp.float32),
        grid=(n_steps,),
        in_specs=[
            per_batch3(tgt.shape),
            per_batch3(pos.shape),
            per_batch3(src.shape),
            per_batch3(mask_bias.shape),
            pl.BlockSpec((MAT_ROWS_PAD, LANE), lambda b: (0, 0)),   # replicated weight slab
            pl.BlockSpec((VEC_ROWS_PAD, LANE), lambda b: (0, 0)),   # replicated bias/norm slab
        ],
        out_specs=per_batch3((B, Lq, D)),
        compiler_params=pltpu.CompilerParams(dimension_semantics=("parallel",)),
    )(tgt, pos, src, mask_bias, wmat, wvec)


# ---------------------------------------------------------------------------
# Pure-JAX reference (replicates the PyTorch forward in eval mode), on unpacked params.
# ---------------------------------------------------------------------------


def _layer_norm_ref(x, w, b, eps=1e-5):
    m = jnp.mean(x, axis=-1, keepdims=True)
    v = jnp.mean((x - m) ** 2, axis=-1, keepdims=True)
    return (x - m) * lax.rsqrt(v + eps) * w + b


def _mha_ref(q, k, v, wq, bq, wk, bk, wv, bv, wo, bo, mask_bias=None):
    scale = 1.0 / math.sqrt(HEAD_DIM)
    qp = q @ wq.T + bq
    kp = k @ wk.T + bk
    vp = v @ wv.T + bv
    outs = []
    for h in range(N_HEADS):
        s0, s1 = h * HEAD_DIM, (h + 1) * HEAD_DIM
        s = (qp[:, s0:s1] * scale) @ kp[:, s0:s1].T
        if mask_bias is not None:
            s = s + mask_bias
        s = s - jnp.max(s, axis=-1, keepdims=True)
        p = jnp.exp(s)
        p = p / jnp.sum(p, axis=-1, keepdims=True)
        outs.append(p @ vp[:, s0:s1])
    return jnp.concatenate(outs, axis=-1) @ wo.T + bo


def reference(tgt, pos, src, mask, params):
    p = params

    def one(tgt, pos, src, mask):
        mb = jnp.where(mask, 0.0, -1e30)[None, :]
        qk = tgt + pos
        t2 = _mha_ref(qk, qk, tgt, p["sa_wq"], p["sa_bq"], p["sa_wk"], p["sa_bk"],
                      p["sa_wv"], p["sa_bv"], p["sa_wo"], p["sa_bo"], None)
        tgt = _layer_norm_ref(tgt + t2, p["n2_w"], p["n2_b"])
        q = tgt + pos
        t2 = _mha_ref(q, src, src, p["ca_wq"], p["ca_bq"], p["ca_wk"], p["ca_bk"],
                      p["ca_wv"], p["ca_bv"], p["ca_wo"], p["ca_bo"], mb)
        tgt = _layer_norm_ref(tgt + t2, p["n1_w"], p["n1_b"])
        h = jnp.maximum(tgt @ p["l1_w"].T + p["l1_b"], 0.0)
        t2 = h @ p["l2_w"].T + p["l2_b"]
        return _layer_norm_ref(tgt + t2, p["n3_w"], p["n3_b"])

    return jax.vmap(one)(tgt, pos, src, mask)


def init_params(key):
    keys = jax.random.split(key, 32)
    it = iter(keys)

    def w(shape, scale=0.05):
        return (scale * jax.random.normal(next(it), shape)).astype(jnp.float32)

    p = {}
    for pre in ("sa", "ca"):
        p[f"{pre}_wq"] = w((D_MODEL, D_MODEL))
        p[f"{pre}_wk"] = w((D_MODEL, D_MODEL))
        p[f"{pre}_wv"] = w((D_MODEL, D_MODEL))
        p[f"{pre}_bq"] = w((1, D_MODEL))
        p[f"{pre}_bk"] = w((1, D_MODEL))
        p[f"{pre}_bv"] = w((1, D_MODEL))
        p[f"{pre}_wo"] = w((D_MODEL, D_MODEL))
        p[f"{pre}_bo"] = w((1, D_MODEL))
    for n in ("n1", "n2", "n3"):
        p[f"{n}_w"] = jnp.ones((1, D_MODEL), jnp.float32)
        p[f"{n}_b"] = jnp.zeros((1, D_MODEL), jnp.float32)
    p["l1_w"] = w((D_FFN, D_MODEL))
    p["l1_b"] = w((1, D_FFN))
    p["l2_w"] = w((D_MODEL, D_FFN))
    p["l2_b"] = w((1, D_MODEL))
    return p


if __name__ == "__main__":
    key = jax.random.PRNGKey(0)
    k1, k2, k3, kp = jax.random.split(key, 4)

    B, Lq, Lk = 2, 8, 16
    tgt = jax.random.normal(k1, (B, Lq, D_MODEL), jnp.float32)
    pos = jax.random.normal(k2, (B, Lq, D_MODEL), jnp.float32)
    src = jax.random.normal(k3, (B, Lk, D_MODEL), jnp.float32)
    # True = valid key; pad the last 3 keys of batch 0
    mask = jnp.ones((B, Lk), dtype=bool).at[0, Lk - 3:].set(False)

    params = init_params(kp)

    out = detr_decoder_layer(tgt, pos, src, mask, params)
    out = jax.block_until_ready(out)

    ref = reference(tgt, pos, src, mask, params)
    np.testing.assert_allclose(np.asarray(out), np.asarray(ref), rtol=2e-4, atol=2e-4)

    print("KERNEL_OK")
</pallas_src>

<mosaic_0001>
module attributes {stable_mosaic.version = 11 : i64} {
  func.func @decoder_layer_kernel(%arg0: i32, %arg1: memref<1x8x32xf32, #tpu.memory_space<vmem>>, %arg2: memref<1x8x32xf32, #tpu.memory_space<vmem>>, %arg3: memref<1x16x32xf32, #tpu.memory_space<vmem>>, %arg4: memref<1x1x16xf32, #tpu.memory_space<vmem>>, %arg5: memref<288x128xf32, #tpu.memory_space<vmem>>, %arg6: memref<16x128xf32, #tpu.memory_space<vmem>>, %arg7: memref<1x8x32xf32, #tpu.memory_space<vmem>>) attributes {dimension_semantics = [#tpu.dimension_semantics<parallel>], iteration_bounds = array<i64: 2>, scalar_prefetch = 0 : i64, scratch_operands = 0 : i64, tpu.core_type = #tpu.core_type<tc>, window_params = [{transform_indices = @transform_0, window_bounds = array<i64: 1, 8, 32>}, {transform_indices = @transform_1, window_bounds = array<i64: 1, 8, 32>}, {transform_indices = @transform_2, window_bounds = array<i64: 1, 16, 32>}, {transform_indices = @transform_3, window_bounds = array<i64: 1, 1, 16>}, {pipeline_mode = #tpu.pipeline_mode<synchronous>, transform_indices = @transform_4, window_bounds = array<i64: 288, 128>}, {pipeline_mode = #tpu.pipeline_mode<synchronous>, transform_indices = @transform_5, window_bounds = array<i64: 16, 128>}, {transform_indices = @transform_6, window_bounds = array<i64: 1, 8, 32>}]} {
    %c0 = arith.constant 0 : index
    %c0_0 = arith.constant 0 : index
    %0 = vector.load %arg6[%c0, %c0_0] : memref<16x128xf32, #tpu.memory_space<vmem>>, vector<16x128xf32>
    %c0_1 = arith.constant 0 : index
    %c0_2 = arith.constant 0 : index
    %c0_3 = arith.constant 0 : index
    %1 = vector.load %arg1[%c0_1, %c0_2, %c0_3] : memref<1x8x32xf32, #tpu.memory_space<vmem>>, vector<1x8x32xf32>
    %2 = vector.shape_cast %1 : vector<1x8x32xf32> to vector<8x32xf32>
    %c0_4 = arith.constant 0 : index
    %c0_5 = arith.constant 0 : index
    %c0_6 = arith.constant 0 : index
    %3 = vector.load %arg2[%c0_4, %c0_5, %c0_6] : memref<1x8x32xf32, #tpu.memory_space<vmem>>, vector<1x8x32xf32>
    %4 = vector.shape_cast %3 : vector<1x8x32xf32> to vector<8x32xf32>
    %c0_7 = arith.constant 0 : index
    %c0_8 = arith.constant 0 : index
    %c0_9 = arith.constant 0 : index
    %5 = vector.load %arg3[%c0_7, %c0_8, %c0_9] : memref<1x16x32xf32, #tpu.memory_space<vmem>>, vector<1x16x32xf32>
    %6 = vector.shape_cast %5 : vector<1x16x32xf32> to vector<16x32xf32>
    %7 = arith.addf %2, %4 : vector<8x32xf32>
    %c0_10 = arith.constant 0 : index
    %c0_11 = arith.constant 0 : index
    %8 = vector.load %arg5[%c0_10, %c0_11] : memref<288x128xf32, #tpu.memory_space<vmem>>, vector<32x64xf32>
    %cst = arith.constant dense<0.000000e+00> : vector<8x64xf32>
    %9 = tpu.matmul %7, %8, %cst {dimension_numbers = #tpu.dot_dimension_numbers<[1], [0], [0], [1], [0, 0, 1, 1], [], []>} : vector<8x32xf32>, vector<32x64xf32>, vector<8x64xf32> -> vector<8x64xf32>
    %10 = vector.extract_strided_slice %0 {offsets = [0, 0], sizes = [1, 64], strides = [1, 1]} : vector<16x128xf32> to vector<1x64xf32>
    %11 = vector.broadcast %10 : vector<1x64xf32> to vector<8x64xf32>
    %12 = arith.addf %9, %11 : vector<8x64xf32>
    %c32 = arith.constant 32 : index
    %c0_12 = arith.constant 0 : index
    %13 = vector.load %arg5[%c32, %c0_12] : memref<288x128xf32, #tpu.memory_space<vmem>>, vector<32x32xf32>
    %cst_13 = arith.constant dense<0.000000e+00> : vector<8x32xf32>
    %14 = tpu.matmul %2, %13, %cst_13 {dimension_numbers = #tpu.dot_dimension_numbers<[1], [0], [0], [1], [0, 0, 1, 1], [], []>} : vector<8x32xf32>, vector<32x32xf32>, vector<8x32xf32> -> vector<8x32xf32>
    %15 = vector.extract_strided_slice %0 {offsets = [1, 0], sizes = [1, 32], strides = [1, 1]} : vector<16x128xf32> to vector<1x32xf32>
    %16 = vector.broadcast %15 : vector<1x32xf32> to vector<8x32xf32>
    %17 = arith.addf %14, %16 : vector<8x32xf32>
    %18 = vector.extract_strided_slice %12 {offsets = [0, 0], sizes = [8, 8], strides = [1, 1]} : vector<8x64xf32> to vector<8x8xf32>
    %19 = vector.extract_strided_slice %12 {offsets = [0, 8], sizes = [8, 8], strides = [1, 1]} : vector<8x64xf32> to vector<8x8xf32>
    %20 = vector.extract_strided_slice %12 {offsets = [0, 16], sizes = [8, 8], strides = [1, 1]} : vector<8x64xf32> to vector<8x8xf32>
    %21 = vector.extract_strided_slice %12 {offsets = [0, 24], sizes = [8, 8], strides = [1, 1]} : vector<8x64xf32> to vector<8x8xf32>
    %22 = vector.shape_cast %18 : vector<8x8xf32> to vector<1x8x8xf32>
    %23 = vector.shape_cast %19 : vector<8x8xf32> to vector<1x8x8xf32>
    %24 = vector.shape_cast %20 : vector<8x8xf32> to vector<1x8x8xf32>
    %25 = vector.shape_cast %21 : vector<8x8xf32> to vector<1x8x8xf32>
    %26 = tpu.concatenate %22, %23, %24, %25 in 0 : vector<1x8x8xf32>, vector<1x8x8xf32>, vector<1x8x8xf32>, vector<1x8x8xf32> -> vector<4x8x8xf32>
    %27 = vector.extract_strided_slice %12 {offsets = [0, 32], sizes = [8, 8], strides = [1, 1]} : vector<8x64xf32> to vector<8x8xf32>
    %28 = vector.extract_strided_slice %12 {offsets = [0, 40], sizes = [8, 8], strides = [1, 1]} : vector<8x64xf32> to vector<8x8xf32>
    %29 = vector.extract_strided_slice %12 {offsets = [0, 48], sizes = [8, 8], strides = [1, 1]} : vector<8x64xf32> to vector<8x8xf32>
    %30 = vector.extract_strided_slice %12 {offsets = [0, 56], sizes = [8, 8], strides = [1, 1]} : vector<8x64xf32> to vector<8x8xf32>
    %31 = vector.shape_cast %27 : vector<8x8xf32> to vector<1x8x8xf32>
    %32 = vector.shape_cast %28 : vector<8x8xf32> to vector<1x8x8xf32>
    %33 = vector.shape_cast %29 : vector<8x8xf32> to vector<1x8x8xf32>
    %34 = vector.shape_cast %30 : vector<8x8xf32> to vector<1x8x8xf32>
    %35 = tpu.concatenate %31, %32, %33, %34 in 0 : vector<1x8x8xf32>, vector<1x8x8xf32>, vector<1x8x8xf32>, vector<1x8x8xf32> -> vector<4x8x8xf32>
    %36 = vector.extract_strided_slice %17 {offsets = [0, 0], sizes = [8, 8], strides = [1, 1]} : vector<8x32xf32> to vector<8x8xf32>
    %37 = vector.extract_strided_slice %17 {offsets = [0, 8], sizes = [8, 8], strides = [1, 1]} : vector<8x32xf32> to vector<8x8xf32>
    %38 = vector.extract_strided_slice %17 {offsets = [0, 16], sizes = [8, 8], strides = [1, 1]} : vector<8x32xf32> to vector<8x8xf32>
    %39 = vector.extract_strided_slice %17 {offsets = [0, 24], sizes = [8, 8], strides = [1, 1]} : vector<8x32xf32> to vector<8x8xf32>
    %40 = vector.shape_cast %36 : vector<8x8xf32> to vector<1x8x8xf32>
    %41 = vector.shape_cast %37 : vector<8x8xf32> to vector<1x8x8xf32>
    %42 = vector.shape_cast %38 : vector<8x8xf32> to vector<1x8x8xf32>
    %43 = vector.shape_cast %39 : vector<8x8xf32> to vector<1x8x8xf32>
    %44 = tpu.concatenate %40, %41, %42, %43 in 0 : vector<1x8x8xf32>, vector<1x8x8xf32>, vector<1x8x8xf32>, vector<1x8x8xf32> -> vector<4x8x8xf32>
    "tpu.trace_start"() <{level = 10 : i32, message = "hqd,hkd->hqk"}> : () -> ()
    %cst_14 = arith.constant dense<0.000000e+00> : vector<4x8x8xf32>
    %45 = tpu.matmul %26, %35, %cst_14 {dimension_numbers = #tpu.dot_dimension_numbers<[2], [2], [1], [1], [0, 0, 0, 1, 1, 1], [0], [0]>} : vector<4x8x8xf32>, vector<4x8x8xf32>, vector<4x8x8xf32> -> vector<4x8x8xf32>
    "tpu.trace_stop"() : () -> ()
    %cst_15 = arith.constant dense<0xFF800000> : vector<4x8xf32>
    %46 = vector.multi_reduction <maximumf>, %45, %cst_15 [2] : vector<4x8x8xf32> to vector<4x8xf32>
    %47 = vector.shape_cast %46 : vector<4x8xf32> to vector<4x8x1xf32>
    %48 = vector.broadcast %47 : vector<4x8x1xf32> to vector<4x8x8xf32>
    %49 = arith.subf %45, %48 : vector<4x8x8xf32>
    %50 = math.exp %49 : vector<4x8x8xf32>
    %cst_16 = arith.constant dense<0.000000e+00> : vector<4x8xf32>
    %51 = vector.multi_reduction <add>, %50, %cst_16 [2] : vector<4x8x8xf32> to vector<4x8xf32>
    %52 = vector.shape_cast %51 : vector<4x8xf32> to vector<4x8x1xf32>
    %53 = tpu.reciprocal %52 : vector<4x8x1xf32> -> vector<4x8x1xf32>
    %54 = vector.broadcast %53 : vector<4x8x1xf32> to vector<4x8x8xf32>
    %55 = arith.mulf %50, %54 : vector<4x8x8xf32>
    "tpu.trace_start"() <{level = 10 : i32, message = "hqk,hkd->hqd"}> : () -> ()
    %cst_17 = arith.constant dense<0.000000e+00> : vector<4x8x8xf32>
    %56 = tpu.matmul %55, %44, %cst_17 {dimension_numbers = #tpu.dot_dimension_numbers<[2], [1], [1], [2], [0, 0, 0, 1, 1, 2], [0], [0]>} : vector<4x8x8xf32>, vector<4x8x8xf32>, vector<4x8x8xf32> -> vector<4x8x8xf32>
    "tpu.trace_stop"() : () -> ()
    %57 = vector.extract_strided_slice %56 {offsets = [0, 0, 0], sizes = [1, 8, 8], strides = [1, 1, 1]} : vector<4x8x8xf32> to vector<1x8x8xf32>
    %58 = vector.shape_cast %57 : vector<1x8x8xf32> to vector<8x8xf32>
    %59 = vector.extract_strided_slice %56 {offsets = [1, 0, 0], sizes = [1, 8, 8], strides = [1, 1, 1]} : vector<4x8x8xf32> to vector<1x8x8xf32>
    %60 = vector.shape_cast %59 : vector<1x8x8xf32> to vector<8x8xf32>
    %61 = vector.extract_strided_slice %56 {offsets = [2, 0, 0], sizes = [1, 8, 8], strides = [1, 1, 1]} : vector<4x8x8xf32> to vector<1x8x8xf32>
    %62 = vector.shape_cast %61 : vector<1x8x8xf32> to vector<8x8xf32>
    %63 = vector.extract_strided_slice %56 {offsets = [3, 0, 0], sizes = [1, 8, 8], strides = [1, 1, 1]} : vector<4x8x8xf32> to vector<1x8x8xf32>
    %64 = vector.shape_cast %63 : vector<1x8x8xf32> to vector<8x8xf32>
    %65 = tpu.concatenate %58, %60, %62, %64 in 1 : vector<8x8xf32>, vector<8x8xf32>, vector<8x8xf32>, vector<8x8xf32> -> vector<8x32xf32>
    %c64 = arith.constant 64 : index
    %c0_18 = arith.constant 0 : index
    %66 = vector.load %arg5[%c64, %c0_18] : memref<288x128xf32, #tpu.memory_space<vmem>>, vector<32x32xf32>
    %cst_19 = arith.constant dense<0.000000e+00> : vector<8x32xf32>
    %67 = tpu.matmul %65, %66, %cst_19 {dimension_numbers = #tpu.dot_dimension_numbers<[1], [0], [0], [1], [0, 0, 1, 1], [], []>} : vector<8x32xf32>, vector<32x32xf32>, vector<8x32xf32> -> vector<8x32xf32>
    %68 = vector.extract_strided_slice %0 {offsets = [2, 0], sizes = [1, 32], strides = [1, 1]} : vector<16x128xf32> to vector<1x32xf32>
    %69 = vector.broadcast %68 : vector<1x32xf32> to vector<8x32xf32>
    %70 = arith.addf %67, %69 : vector<8x32xf32>
    %71 = arith.addf %2, %70 : vector<8x32xf32>
    %72 = vector.extract_strided_slice %0 {offsets = [10, 0], sizes = [1, 32], strides = [1, 1]} : vector<16x128xf32> to vector<1x32xf32>
    %73 = vector.extract_strided_slice %0 {offsets = [11, 0], sizes = [1, 32], strides = [1, 1]} : vector<16x128xf32> to vector<1x32xf32>
    %cst_20 = arith.constant dense<0.000000e+00> : vector<8xf32>
    %74 = vector.multi_reduction <add>, %71, %cst_20 [1] : vector<8x32xf32> to vector<8xf32>
    %75 = vector.shape_cast %74 : vector<8xf32> to vector<8x1xf32>
    %cst_21 = arith.constant 3.200000e+01 : f32
    %76 = vector.broadcast %cst_21 : f32 to vector<8x1xf32>
    %77 = arith.divf %75, %76 : vector<8x1xf32>
    %78 = vector.broadcast %77 : vector<8x1xf32> to vector<8x32xf32>
    %79 = arith.subf %71, %78 : vector<8x32xf32>
    %80 = arith.mulf %79, %79 : vector<8x32xf32>
    %cst_22 = arith.constant dense<0.000000e+00> : vector<8xf32>
    %81 = vector.multi_reduction <add>, %80, %cst_22 [1] : vector<8x32xf32> to vector<8xf32>
    %82 = vector.shape_cast %81 : vector<8xf32> to vector<8x1xf32>
    %cst_23 = arith.constant 3.200000e+01 : f32
    %83 = vector.broadcast %cst_23 : f32 to vector<8x1xf32>
    %84 = arith.divf %82, %83 : vector<8x1xf32>
    %85 = vector.broadcast %77 : vector<8x1xf32> to vector<8x32xf32>
    %86 = arith.subf %71, %85 : vector<8x32xf32>
    %cst_24 = arith.constant 9.99999974E-6 : f32
    %87 = vector.broadcast %cst_24 : f32 to vector<8x1xf32>
    %88 = arith.addf %84, %87 : vector<8x1xf32>
    %89 = math.rsqrt %88 : vector<8x1xf32>
    %90 = vector.broadcast %89 : vector<8x1xf32> to vector<8x32xf32>
    %91 = arith.mulf %86, %90 : vector<8x32xf32>
    %92 = vector.broadcast %72 : vector<1x32xf32> to vector<8x32xf32>
    %93 = arith.mulf %91, %92 : vector<8x32xf32>
    %94 = vector.broadcast %73 : vector<1x32xf32> to vector<8x32xf32>
    %95 = arith.addf %93, %94 : vector<8x32xf32>
    %96 = arith.addf %95, %4 : vector<8x32xf32>
    %c96 = arith.constant 96 : index
    %c0_25 = arith.constant 0 : index
    %97 = vector.load %arg5[%c96, %c0_25] : memref<288x128xf32, #tpu.memory_space<vmem>>, vector<32x32xf32>
    %cst_26 = arith.constant dense<0.000000e+00> : vector<8x32xf32>
    %98 = tpu.matmul %96, %97, %cst_26 {dimension_numbers = #tpu.dot_dimension_numbers<[1], [0], [0], [1], [0, 0, 1, 1], [], []>} : vector<8x32xf32>, vector<32x32xf32>, vector<8x32xf32> -> vector<8x32xf32>
    %99 = vector.extract_strided_slice %0 {offsets = [3, 0], sizes = [1, 32], strides = [1, 1]} : vector<16x128xf32> to vector<1x32xf32>
    %100 = vector.broadcast %99 : vector<1x32xf32> to vector<8x32xf32>
    %101 = arith.addf %98, %100 : vector<8x32xf32>
    %c128 = arith.constant 128 : index
    %c0_27 = arith.constant 0 : index
    %102 = vector.load %arg5[%c128, %c0_27] : memref<288x128xf32, #tpu.memory_space<vmem>>, vector<32x64xf32>
    %cst_28 = arith.constant dense<0.000000e+00> : vector<16x64xf32>
    %103 = tpu.matmul %6, %102, %cst_28 {dimension_numbers = #tpu.dot_dimension_numbers<[1], [0], [0], [1], [0, 0, 1, 1], [], []>} : vector<16x32xf32>, vector<32x64xf32>, vector<16x64xf32> -> vector<16x64xf32>
    %104 = vector.extract_strided_slice %0 {offsets = [4, 0], sizes = [1, 64], strides = [1, 1]} : vector<16x128xf32> to vector<1x64xf32>
    %105 = vector.broadcast %104 : vector<1x64xf32> to vector<16x64xf32>
    %106 = arith.addf %103, %105 : vector<16x64xf32>
    %107 = vector.extract_strided_slice %101 {offsets = [0, 0], sizes = [8, 8], strides = [1, 1]} : vector<8x32xf32> to vector<8x8xf32>
    %108 = vector.extract_strided_slice %101 {offsets = [0, 8], sizes = [8, 8], strides = [1, 1]} : vector<8x32xf32> to vector<8x8xf32>
    %109 = vector.extract_strided_slice %101 {offsets = [0, 16], sizes = [8, 8], strides = [1, 1]} : vector<8x32xf32> to vector<8x8xf32>
    %110 = vector.extract_strided_slice %101 {offsets = [0, 24], sizes = [8, 8], strides = [1, 1]} : vector<8x32xf32> to vector<8x8xf32>
    %111 = vector.shape_cast %107 : vector<8x8xf32> to vector<1x8x8xf32>
    %112 = vector.shape_cast %108 : vector<8x8xf32> to vector<1x8x8xf32>
    %113 = vector.shape_cast %109 : vector<8x8xf32> to vector<1x8x8xf32>
    %114 = vector.shape_cast %110 : vector<8x8xf32> to vector<1x8x8xf32>
    %115 = tpu.concatenate %111, %112, %113, %114 in 0 : vector<1x8x8xf32>, vector<1x8x8xf32>, vector<1x8x8xf32>, vector<1x8x8xf32> -> vector<4x8x8xf32>
    %116 = vector.extract_strided_slice %106 {offsets = [0, 0], sizes = [16, 8], strides = [1, 1]} : vector<16x64xf32> to vector<16x8xf32>
    %117 = vector.extract_strided_slice %106 {offsets = [0, 8], sizes = [16, 8], strides = [1, 1]} : vector<16x64xf32> to vector<16x8xf32>
    %118 = vector.extract_strided_slice %106 {offsets = [0, 16], sizes = [16, 8], strides = [1, 1]} : vector<16x64xf32> to vector<16x8xf32>
    %119 = vector.extract_strided_slice %106 {offsets = [0, 24], sizes = [16, 8], strides = [1, 1]} : vector<16x64xf32> to vector<16x8xf32>
    %120 = vector.shape_cast %116 : vector<16x8xf32> to vector<1x16x8xf32>
    %121 = vector.shape_cast %117 : vector<16x8xf32> to vector<1x16x8xf32>
    %122 = vector.shape_cast %118 : vector<16x8xf32> to vector<1x16x8xf32>
    %123 = vector.shape_cast %119 : vector<16x8xf32> to vector<1x16x8xf32>
    %124 = tpu.concatenate %120, %121, %122, %123 in 0 : vector<1x16x8xf32>, vector<1x16x8xf32>, vector<1x16x8xf32>, vector<1x16x8xf32> -> vector<4x16x8xf32>
    %125 = vector.extract_strided_slice %106 {offsets = [0, 32], sizes = [16, 8], strides = [1, 1]} : vector<16x64xf32> to vector<16x8xf32>
    %126 = vector.extract_strided_slice %106 {offsets = [0, 40], sizes = [16, 8], strides = [1, 1]} : vector<16x64xf32> to vector<16x8xf32>
    %127 = vector.extract_strided_slice %106 {offsets = [0, 48], sizes = [16, 8], strides = [1, 1]} : vector<16x64xf32> to vector<16x8xf32>
    %128 = vector.extract_strided_slice %106 {offsets = [0, 56], sizes = [16, 8], strides = [1, 1]} : vector<16x64xf32> to vector<16x8xf32>
    %129 = vector.shape_cast %125 : vector<16x8xf32> to vector<1x16x8xf32>
    %130 = vector.shape_cast %126 : vector<16x8xf32> to vector<1x16x8xf32>
    %131 = vector.shape_cast %127 : vector<16x8xf32> to vector<1x16x8xf32>
    %132 = vector.shape_cast %128 : vector<16x8xf32> to vector<1x16x8xf32>
    %133 = tpu.concatenate %129, %130, %131, %132 in 0 : vector<1x16x8xf32>, vector<1x16x8xf32>, vector<1x16x8xf32>, vector<1x16x8xf32> -> vector<4x16x8xf32>
    %c0_29 = arith.constant 0 : index
    %c0_30 = arith.constant 0 : index
    %c0_31 = arith.constant 0 : index
    %134 = vector.load %arg4[%c0_29, %c0_30, %c0_31] : memref<1x1x16xf32, #tpu.memory_space<vmem>>, vector<1x1x16xf32>
    %135 = vector.shape_cast %134 : vector<1x1x16xf32> to vector<1x16xf32>
    "tpu.trace_start"() <{level = 10 : i32, message = "hqd,hkd->hqk"}> : () -> ()
    %cst_32 = arith.constant dense<0.000000e+00> : vector<4x8x16xf32>
    %136 = tpu.matmul %115, %124, %cst_32 {dimension_numbers = #tpu.dot_dimension_numbers<[2], [2], [1], [1], [0, 0, 0, 1, 1, 1], [0], [0]>} : vector<4x8x8xf32>, vector<4x16x8xf32>, vector<4x8x16xf32> -> vector<4x8x16xf32>
    "tpu.trace_stop"() : () -> ()
    %137 = vector.shape_cast %135 : vector<1x16xf32> to vector<1x1x16xf32>
    %138 = vector.broadcast %137 : vector<1x1x16xf32> to vector<4x8x16xf32>
    %139 = arith.addf %136, %138 : vector<4x8x16xf32>
    %cst_33 = arith.constant dense<0xFF800000> : vector<4x8xf32>
    %140 = vector.multi_reduction <maximumf>, %139, %cst_33 [2] : vector<4x8x16xf32> to vector<4x8xf32>
    %141 = vector.shape_cast %140 : vector<4x8xf32> to vector<4x8x1xf32>
    %142 = vector.broadcast %141 : vector<4x8x1xf32> to vector<4x8x16xf32>
    %143 = arith.subf %139, %142 : vector<4x8x16xf32>
    %144 = math.exp %143 : vector<4x8x16xf32>
    %cst_34 = arith.constant dense<0.000000e+00> : vector<4x8xf32>
    %145 = vector.multi_reduction <add>, %144, %cst_34 [2] : vector<4x8x16xf32> to vector<4x8xf32>
    %146 = vector.shape_cast %145 : vector<4x8xf32> to vector<4x8x1xf32>
    %147 = tpu.reciprocal %146 : vector<4x8x1xf32> -> vector<4x8x1xf32>
    %148 = vector.broadcast %147 : vector<4x8x1xf32> to vector<4x8x16xf32>
    %149 = arith.mulf %144, %148 : vector<4x8x16xf32>
    "tpu.trace_start"() <{level = 10 : i32, message = "hqk,hkd->hqd"}> : () -> ()
    %cst_35 = arith.constant dense<0.000000e+00> : vector<4x8x8xf32>
    %150 = tpu.matmul %149, %133, %cst_35 {dimension_numbers = #tpu.dot_dimension_numbers<[2], [1], [1], [2], [0, 0, 0, 1, 1, 2], [0], [0]>} : vector<4x8x16xf32>, vector<4x16x8xf32>, vector<4x8x8xf32> -> vector<4x8x8xf32>
    "tpu.trace_stop"() : () -> ()
    %151 = vector.extract_strided_slice %150 {offsets = [0, 0, 0], sizes = [1, 8, 8], strides = [1, 1, 1]} : vector<4x8x8xf32> to vector<1x8x8xf32>
    %152 = vector.shape_cast %151 : vector<1x8x8xf32> to vector<8x8xf32>
    %153 = vector.extract_strided_slice %150 {offsets = [1, 0, 0], sizes = [1, 8, 8], strides = [1, 1, 1]} : vector<4x8x8xf32> to vector<1x8x8xf32>
    %154 = vector.shape_cast %153 : vector<1x8x8xf32> to vector<8x8xf32>
    %155 = vector.extract_strided_slice %150 {offsets = [2, 0, 0], sizes = [1, 8, 8], strides = [1, 1, 1]} : vector<4x8x8xf32> to vector<1x8x8xf32>
    %156 = vector.shape_cast %155 : vector<1x8x8xf32> to vector<8x8xf32>
    %157 = vector.extract_strided_slice %150 {offsets = [3, 0, 0], sizes = [1, 8, 8], strides = [1, 1, 1]} : vector<4x8x8xf32> to vector<1x8x8xf32>
    %158 = vector.shape_cast %157 : vector<1x8x8xf32> to vector<8x8xf32>
    %159 = tpu.concatenate %152, %154, %156, %158 in 1 : vector<8x8xf32>, vector<8x8xf32>, vector<8x8xf32>, vector<8x8xf32> -> vector<8x32xf32>
    %c160 = arith.constant 160 : index
    %c0_36 = arith.constant 0 : index
    %160 = vector.load %arg5[%c160, %c0_36] : memref<288x128xf32, #tpu.memory_space<vmem>>, vector<32x32xf32>
    %cst_37 = arith.constant dense<0.000000e+00> : vector<8x32xf32>
    %161 = tpu.matmul %159, %160, %cst_37 {dimension_numbers = #tpu.dot_dimension_numbers<[1], [0], [0], [1], [0, 0, 1, 1], [], []>} : vector<8x32xf32>, vector<32x32xf32>, vector<8x32xf32> -> vector<8x32xf32>
    %162 = vector.extract_strided_slice %0 {offsets = [5, 0], sizes = [1, 32], strides = [1, 1]} : vector<16x128xf32> to vector<1x32xf32>
    %163 = vector.broadcast %162 : vector<1x32xf32> to vector<8x32xf32>
    %164 = arith.addf %161, %163 : vector<8x32xf32>
    %165 = arith.addf %95, %164 : vector<8x32xf32>
    %166 = vector.extract_strided_slice %0 {offsets = [8, 0], sizes = [1, 32], strides = [1, 1]} : vector<16x128xf32> to vector<1x32xf32>
    %167 = vector.extract_strided_slice %0 {offsets = [9, 0], sizes = [1, 32], strides = [1, 1]} : vector<16x128xf32> to vector<1x32xf32>
    %cst_38 = arith.constant dense<0.000000e+00> : vector<8xf32>
    %168 = vector.multi_reduction <add>, %165, %cst_38 [1] : vector<8x32xf32> to vector<8xf32>
    %169 = vector.shape_cast %168 : vector<8xf32> to vector<8x1xf32>
    %cst_39 = arith.constant 3.200000e+01 : f32
    %170 = vector.broadcast %cst_39 : f32 to vector<8x1xf32>
    %171 = arith.divf %169, %170 : vector<8x1xf32>
    %172 = vector.broadcast %171 : vector<8x1xf32> to vector<8x32xf32>
    %173 = arith.subf %165, %172 : vector<8x32xf32>
    %174 = arith.mulf %173, %173 : vector<8x32xf32>
    %cst_40 = arith.constant dense<0.000000e+00> : vector<8xf32>
    %175 = vector.multi_reduction <add>, %174, %cst_40 [1] : vector<8x32xf32> to vector<8xf32>
    %176 = vector.shape_cast %175 : vector<8xf32> to vector<8x1xf32>
    %cst_41 = arith.constant 3.200000e+01 : f32
    %177 = vector.broadcast %cst_41 : f32 to vector<8x1xf32>
    %178 = arith.divf %176, %177 : vector<8x1xf32>
    %179 = vector.broadcast %171 : vector<8x1xf32> to vector<8x32xf32>
    %180 = arith.subf %165, %179 : vector<8x32xf32>
    %cst_42 = arith.constant 9.99999974E-6 : f32
    %181 = vector.broadcast %cst_42 : f32 to vector<8x1xf32>
    %182 = arith.addf %178, %181 : vector<8x1xf32>
    %183 = math.rsqrt %182 : vector<8x1xf32>
    %184 = vector.broadcast %183 : vector<8x1xf32> to vector<8x32xf32>
    %185 = arith.mulf %180, %184 : vector<8x32xf32>
    %186 = vector.broadcast %166 : vector<1x32xf32> to vector<8x32xf32>
    %187 = arith.mulf %185, %186 : vector<8x32xf32>
    %188 = vector.broadcast %167 : vector<1x32xf32> to vector<8x32xf32>
    %189 = arith.addf %187, %188 : vector<8x32xf32>
    %c192 = arith.constant 192 : index
    %c0_43 = arith.constant 0 : index
    %190 = vector.load %arg5[%c192, %c0_43] : memref<288x128xf32, #tpu.memory_space<vmem>>, vector<32x64xf32>
    %cst_44 = arith.constant dense<0.000000e+00> : vector<8x64xf32>
    %191 = tpu.matmul %189, %190, %cst_44 {dimension_numbers = #tpu.dot_dimension_numbers<[1], [0], [0], [1], [0, 0, 1, 1], [], []>} : vector<8x32xf32>, vector<32x64xf32>, vector<8x64xf32> -> vector<8x64xf32>
    %192 = vector.extract_strided_slice %0 {offsets = [6, 0], sizes = [1, 64], strides = [1, 1]} : vector<16x128xf32> to vector<1x64xf32>
    %193 = vector.broadcast %192 : vector<1x64xf32> to vector<8x64xf32>
    %194 = arith.addf %191, %193 : vector<8x64xf32>
    %cst_45 = arith.constant 0.000000e+00 : f32
    %195 = vector.broadcast %cst_45 : f32 to vector<8x64xf32>
    %196 = arith.maximumf %194, %195 : vector<8x64xf32>
    %c224 = arith.constant 224 : index
    %c0_46 = arith.constant 0 : index
    %197 = vector.load %arg5[%c224, %c0_46] : memref<288x128xf32, #tpu.memory_space<vmem>>, vector<64x32xf32>
    %cst_47 = arith.constant dense<0.000000e+00> : vector<8x32xf32>
    %198 = tpu.matmul %196, %197, %cst_47 {dimension_numbers = #tpu.dot_dimension_numbers<[1], [0], [0], [1], [0, 0, 1, 1], [], []>} : vector<8x64xf32>, vector<64x32xf32>, vector<8x32xf32> -> vector<8x32xf32>
    %199 = vector.extract_strided_slice %0 {offsets = [7, 0], sizes = [1, 32], strides = [1, 1]} : vector<16x128xf32> to vector<1x32xf32>
    %200 = vector.broadcast %199 : vector<1x32xf32> to vector<8x32xf32>
    %201 = arith.addf %198, %200 : vector<8x32xf32>
    %202 = arith.addf %189, %201 : vector<8x32xf32>
    %203 = vector.extract_strided_slice %0 {offsets = [12, 0], sizes = [1, 32], strides = [1, 1]} : vector<16x128xf32> to vector<1x32xf32>
    %204 = vector.extract_strided_slice %0 {offsets = [13, 0], sizes = [1, 32], strides = [1, 1]} : vector<16x128xf32> to vector<1x32xf32>
    %cst_48 = arith.constant dense<0.000000e+00> : vector<8xf32>
    %205 = vector.multi_reduction <add>, %202, %cst_48 [1] : vector<8x32xf32> to vector<8xf32>
    %206 = vector.shape_cast %205 : vector<8xf32> to vector<8x1xf32>
    %cst_49 = arith.constant 3.200000e+01 : f32
    %207 = vector.broadcast %cst_49 : f32 to vector<8x1xf32>
    %208 = arith.divf %206, %207 : vector<8x1xf32>
    %209 = vector.broadcast %208 : vector<8x1xf32> to vector<8x32xf32>
    %210 = arith.subf %202, %209 : vector<8x32xf32>
    %211 = arith.mulf %210, %210 : vector<8x32xf32>
    %cst_50 = arith.constant dense<0.000000e+00> : vector<8xf32>
    %212 = vector.multi_reduction <add>, %211, %cst_50 [1] : vector<8x32xf32> to vector<8xf32>
    %213 = vector.shape_cast %212 : vector<8xf32> to vector<8x1xf32>
    %cst_51 = arith.constant 3.200000e+01 : f32
    %214 = vector.broadcast %cst_51 : f32 to vector<8x1xf32>
    %215 = arith.divf %213, %214 : vector<8x1xf32>
    %216 = vector.broadcast %208 : vector<8x1xf32> to vector<8x32xf32>
    %217 = arith.subf %202, %216 : vector<8x32xf32>
    %cst_52 = arith.constant 9.99999974E-6 : f32
    %218 = vector.broadcast %cst_52 : f32 to vector<8x1xf32>
    %219 = arith.addf %215, %218 : vector<8x1xf32>
    %220 = math.rsqrt %219 : vector<8x1xf32>
    %221 = vector.broadcast %220 : vector<8x1xf32> to vector<8x32xf32>
    %222 = arith.mulf %217, %221 : vector<8x32xf32>
    %223 = vector.broadcast %203 : vector<1x32xf32> to vector<8x32xf32>
    %224 = arith.mulf %222, %223 : vector<8x32xf32>
    %225 = vector.broadcast %204 : vector<1x32xf32> to vector<8x32xf32>
    %226 = arith.addf %224, %225 : vector<8x32xf32>
    %c0_53 = arith.constant 0 : index
    %c0_54 = arith.constant 0 : index
    %c0_55 = arith.constant 0 : index
    %227 = vector.load %arg7[%c0_53, %c0_54, %c0_55] : memref<1x8x32xf32, #tpu.memory_space<vmem>>, vector<1x8x32xf32>
    %228 = vector.shape_cast %227 : vector<1x8x32xf32> to vector<8x32xf32>
    %229 = vector.shape_cast %226 : vector<8x32xf32> to vector<1x8x32xf32>
    tpu.vector_store %arg7[%c0_53, %c0_54, %c0_55], %229 {strides = array<i32>} : memref<1x8x32xf32, #tpu.memory_space<vmem>>, vector<1x8x32xf32>,
    return
  }
  func.func @transform_0(%arg0: i32) -> (i32, i32, i32) {
    %c0_i32 = arith.constant 0 : i32
    %c0_i32_0 = arith.constant 0 : i32
    %c0_i32_1 = arith.constant 0 : i32
    return %arg0, %c0_i32, %c0_i32_0 : i32, i32, i32
  }
  func.func @transform_1(%arg0: i32) -> (i32, i32, i32) {
    %c0_i32 = arith.constant 0 : i32
    %c0_i32_0 = arith.constant 0 : i32
    %c0_i32_1 = arith.constant 0 : i32
    return %arg0, %c0_i32, %c0_i32_0 : i32, i32, i32
  }
  func.func @transform_2(%arg0: i32) -> (i32, i32, i32) {
    %c0_i32 = arith.constant 0 : i32
    %c0_i32_0 = arith.constant 0 : i32
    %c0_i32_1 = arith.constant 0 : i32
    return %arg0, %c0_i32, %c0_i32_0 : i32, i32, i32
  }
  func.func @transform_3(%arg0: i32) -> (i32, i32, i32) {
    %c0_i32 = arith.constant 0 : i32
    %c0_i32_0 = arith.constant 0 : i32
    %c0_i32_1 = arith.constant 0 : i32
    return %arg0, %c0_i32, %c0_i32_0 : i32, i32, i32
  }
  func.func @transform_4(%arg0: i32) -> (i32, i32) {
    %c0_i32 = arith.constant 0 : i32
    %c0_i32_0 = arith.constant 0 : i32
    %c0_i32_1 = arith.constant 0 : i32
    return %c0_i32, %c0_i32_0 : i32, i32
  }
  func.func @transform_5(%arg0: i32) -> (i32, i32) {
    %c0_i32 = arith.constant 0 : i32
    %c0_i32_0 = arith.constant 0 : i32
    %c0_i32_1 = arith.constant 0 : i32
    return %c0_i32, %c0_i32_0 : i32, i32
  }
  func.func @transform_6(%arg0: i32) -> (i32, i32, i32) {
    %c0_i32 = arith.constant 0 : i32
    %c0_i32_0 = arith.constant 0 : i32
    %c0_i32_1 = arith.constant 0 : i32
    return %arg0, %c0_i32, %c0_i32_0 : i32, i32, i32
  }
}

</mosaic_0001>

<bundles_post_ra>
// kernel: tpu_custom_call.1
= control target key start
LH: loop header
LB: loop body
LE: loop exit
PB: predicated region body
PF: predicated region fallthrough
CT: control target
= control target key end

     0   :  { %s4021_s0 = inlined_call_operand.hbm [shape: f32[2,8,32], index: 0, kind: input, shape index: {}]   ;;  %s4022_s1 = inlined_call_operand.hbm [shape: f32[2,8,32], index: 1, kind: input, shape index: {}]   ;;  %s4023_s2 = inlined_call_operand.hbm [shape: f32[2,16,32], index: 2, kind: input, shape index: {}]   ;;  %s4024_s3 = inlined_call_operand.vmem [shape: f32[2,1,16], index: 3, kind: input, shape index: {}]   ;;  %s4025_s4 = inlined_call_operand.hbm [shape: f32[288,128], index: 4, kind: input, shape index: {}]   ;;  %s4026_s5 = inlined_call_operand.vmem [shape: f32[16,128], index: 5, kind: input, shape index: {}]   ;;  %s4027_s6 = inlined_call_operand.hbm [shape: f32[2,8,32], index: 6, kind: output, shape index: {}]  }
   0x1   :  { %4044 = sst [smem:[#allocation21_spill]] %s4022_s1 }
   0x2   :  { %4045 = sst [smem:[#allocation22_spill]] %s4027_s6 }
   0x3   :  { %11 = vsyncpa [#allocation3], 0 }
   0x4   :  { %13 = vsyncpa [#allocation3 + $0x1], 0 }
   0x5   :  { %14 = vsyncpa [#allocation6], 0 }
   0x6   :  { %16 = vsyncpa [#allocation6 + $0x1], 0 }
   0x7   :  { %17 = vsyncpa [#allocation9], 0 }
   0x8   :  { %18 = vsyncpa [#allocation4], 0 }
   0x9   :  { %20 = vsyncpa [#allocation4 + $0x1], 0  ;;  %s3462_s21 = smov 0   ;;  %s3464_s22 = smov 0  }
   0xa   :  { %s3466_s23 = smov 0   ;;  %s3468_s24 = smov 0  }
   0xb LB: > { %4046 = sst [smem:[#allocation15_spill]] %s3396_s21  ;;  %s3483_s25 = sadd.s32 1, %s3408_s24   ;;  %s3408_s24 = sphi %s3468_s24, %s4076_s24   ;;  %s3404_s23 = sphi %s3466_s23, %s4078_s23   ;;  %s3400_s22 = sphi %s3464_s22, %s4080_s22   ;;  %s3396_s21 = sphi %s3462_s21, %s4079_s21  }
   0xc   : > { %4047 = sst [smem:[#allocation16_spill]] %s3404_s23  ;;  %s33_s26 = sadd.s32 1, %s3404_s23 }
   0xd   : > { %4048 = sst [smem:[#allocation17_spill]] %s3408_s24  ;;  %s30_s27 = ssub.s32 %s3408_s24, %s3483_s25 }
   0xe   : > { %4049 = sst [smem:[#allocation18_spill]] %s3483_s25  ;;  %p4028_p0 = scmp.ne.s32.totalorder %s3404_s23, %s3400_s22 }
   0xf   : > { %p31_p1 = scmp.eq.s32.totalorder %s30_s27, 0  ;;  %p41_p2 = scmp.eq.s32.totalorder %s3408_s24, 0 }
  0x10   : > { %p3095_p4 = scmp.lt.s32.totalorder %s3408_s24, 2  ;;  %s3500_s29 = sand.u32 1, %s3404_s23  }
  0x11   : > { %s3494_s28 = scalar_select %p31_p1, %s3404_s23, %s33_s26  }
  0x12   : > { %p42_p5 = por %p41_p2, %p4028_p0  ;;  %s2647_s30 = sshll.u32 %s3500_s29, 3 }
  0x13   : > { %4050 = sst [smem:[#allocation19_spill]] %s3494_s28  ;;  %s2648_s7 = sshll.u32 %s3408_s24, 7 }
  0x14   : > { %p3504_p6 = pnand %p3095_p4, %p42_p5  ;;  %s250_s9 = sand.u32 1, %s3408_s24  }
  0x15   : > { %s4052_s1 = sld [smem:[#allocation21_spill]]  ;;  %s254_s13 = scalar_lea.vmem [#allocation5], %s2647_s30 }
  0x16   : > { %s4051_s8 = scalar_select %p3504_p6, 1, 0 }
  0x17   : > { %s261_s14 = sshll.u32 %s254_s13, 4  ;;  %s2651_s15 = sshll.u32 %s3500_s29, 4  ;;  %s3519_s14 = int_to_ptr.vmem [resolvable:$true] %s261_s14 }
  0x18   : > { %s3521_s16 = scalar_lea.sflag [#allocation6], %s250_s9  ;;  %p3527_p8 = pneg %p3504_p6 }
  0x1a   : > { %s4053_s18 = scalar_select %p3527_p8, 1, 0 }
  0x1b   : > { %s3514_s12 = scalar_lea.hbm %s4052_s1, %s2648_s7  ;;  %s3221_s26 = scalar_lea.hbm %s4052_s1, 256 }
  0x1c   : > { %s3216_s17 = scalar_lea.hbm %s3514_s12, 128  ;;  %p3222_p11 = scmp.lt.u32.totalorder %s3514_s12, %s4052_s1 }
  0x1d   : > { %p3217_p7 = scmp.ne.s32.totalorder %s3514_s12, %s3216_s17  ;;  %p3223_p12 = scmp.lt.u32.totalorder %s3221_s26, %s3216_s17 }
  0x1e   : > { %p3225_p1 = scmp.lt.u32.totalorder %s3216_s17, %s3514_s12 }
  0x1f   : > { %p3219_p9 = pnand %p3527_p8, %p3217_p7  ;;  %p3224_p13 = por %p3223_p12, %p3222_p11 }
  0x21   : > { %p3220_p10 = pneg %p3219_p9  ;;  %p3226_p2 = por %p3225_p1, %p3224_p13 }
  0x23   : > { %p3227_p4 = pnand %p3226_p2, %p3220_p10 }
  0x25   : > { %3230 = shalt.err (!%p3227_p4)
}
  0x26   : > { %s3231_s9 = scalar_lea.vmem %s3519_s14, 128  ;;  %s3410_s11 = smov [#allocation5]  }
  0x27   : > { %p3232_p5 = scmp.ne.s32.totalorder %s3519_s14, %s3231_s9  ;;  %s3236_s13 = sshll.u32 %s3410_s11, 4  ;;  %s3237_s13 = int_to_ptr.vmem [resolvable:$false] %s3236_s13 }
  0x28   : > { %s3238_s19 = scalar_lea.vmem %s3237_s13, 256  ;;  %p3239_p3 = scmp.lt.s32.totalorder %s3519_s14, %s3237_s13 }
  0x29   : > { %p3234_p7 = pnand %p3232_p5, %p3527_p8  ;;  %p3240_p0 = scmp.lt.s32.totalorder %s3238_s19, %s3231_s9 }
  0x2b   : > { %p3235_p9 = pneg %p3234_p7  ;;  %p3241_p11 = por %p3240_p0, %p3239_p3 }
  0x2d   : > { %p3242_p12 = pnand %p3241_p11, %p3235_p9 }
  0x2f   : > { %3245 = shalt.err (!%p3242_p12)
}
  0x30   : > { %3086 = dma.hbm_to_vmem [thread:$0]  (!%p3504_p6), %s3514_s12, 128, %s3519_s14, %s3521_s16  }
  0x31   : > { %s272_s17 = scalar_lea.vmem [#allocation7], %s2651_s15  ;;  %s3556_s26 = sadd.s32 4294967295, %s3408_s24  }
  0x32   : > { %s279_s20 = sshll.u32 %s272_s17, 4  ;;  %s2643_s27 = sadd.s32 4294967294, %s3408_s24   ;;  %s3553_s20 = int_to_ptr.vmem [resolvable:$true] %s279_s20 }
  0x33   : > { %p46_p0 = scmp.ne.s32.totalorder %s3400_s22, %s3396_s21  ;;  %p4035_p3 = scmp.eq.s32.totalorder %s3556_s26, 0 }
  0x34   : > { %p190_p10 = scmp.eq.s32.totalorder %s3556_s26, 1  ;;  %p196_p13 = scmp.eq.s32.totalorder %s2643_s27, 1 }
  0x35   : > { %p3565_p1 = por %p4035_p3, %p46_p0  ;;  %p2644_p2 = scmp.ge.s32.totalorder %s3408_s24, 1 }
  0x36   : > { %p4055_p4 = scmp.ne.s32.totalorder %s3404_s23, %s3400_s22  ;;  %p3577_p7 = por %p196_p13, %p46_p0 }
  0x37   : > { %s4054_s12 = scalar_select %p3565_p1, 1, 0 }
  0x38   : > { %p3573_p5 = por %p190_p10, %p4055_p4  ;;  %p203_p9 = scmp.lt.s32.totalorder %s3408_s24, 3 }
  0x39   : > { %s4057_s15 = scalar_select %p3577_p7, 1, 0 }
  0x3a   : > { %s4056_s14 = scalar_select %p3573_p5, 1, 0 }
  0x3b   : > { %4058 = sst [smem:[#allocation20_spill]] %s4057_s15  ;;  %p3582_p11 = pnand %p2644_p2, %p203_p9 }
  0x3c   : > { %s3411_s9 = smov [#allocation8]   ;;  %s3595_s17 = scalar_lea.hbm %s4021_s0, %s2648_s7 }
  0x3d   : > { %s4059_s10 = scalar_select %p3582_p11, 1, 0 }
  0x3e   : > { %s215_s11 = sshll.u32 %s3411_s9, 4  ;;  %p3076_p12 = pneg %p3582_p11  ;;  %s3586_s11 = int_to_ptr.vmem [resolvable:$true] %s215_s11 }
  0x3f   : > { %s236_s1 = scalar_lea.vmem [#allocation2], %s2647_s30  ;;  %s2702_s9 = sshll.u32 %s3408_s24, 8 }
  0x40   : > { %p3599_p0 = pnand %p3076_p12, %p4035_p3  ;;  %s243_s28 = sshll.u32 %s236_s1, 4  ;;  %s3605_s28 = int_to_ptr.vmem [resolvable:$true] %s243_s28 }
  0x41   : > { %s3611_s15 = scalar_lea.hbm %s4023_s2, %s2702_s9  ;;  %s3246_s19 = scalar_lea.hbm %s4025_s4, 4608 }
  0x42   : > { %p3247_p10 = scmp.ne.s32.totalorder %s4025_s4, %s3246_s19  ;;  %p3248_p13 = pneg %p3599_p0 }
  0x43   : > { %p3253_p9 = scmp.lt.u32.totalorder %s3246_s19, %s4025_s4 }
  0x44   : > { %p3249_p2 = pnand %p3248_p13, %p3247_p10 }
  0x46   : > { %p3250_p4 = pneg %p3249_p2 }
  0x48   : > { %p3255_p12 = pnand %p3253_p9, %p3250_p4 }
  0x4a   : > { %3258 = shalt.err (!%p3255_p12)
}
  0x4b   : > { %s3259_s23 = scalar_lea.vmem %s3586_s11, 4608  ;;  %p3267_p1 = scmp.lt.s32.totalorder %s3586_s11, %s3586_s11 }
  0x4c   : > { %p3260_p3 = scmp.ne.s32.totalorder %s3586_s11, %s3259_s23  ;;  %p3268_p11 = scmp.lt.s32.totalorder %s3259_s23, %s3259_s23 }
  0x4e   : > { %p3262_p7 = pnand %p3260_p3, %p3248_p13  ;;  %p3269_p6 = por %p3268_p11, %p3267_p1 }
  0x50   : > { %p3263_p5 = pneg %p3262_p7 }
  0x52   : > { %p3270_p8 = pnand %p3269_p6, %p3263_p5 }
  0x54   : > { %3273 = shalt.err (!%p3270_p8)
}
  0x55   : > { %s3412_s6 = smov 128   ;;  %s3413_s21 = smov 8  }
  0x56   : > { %3079 = dma.hbm_to_vmem [thread:$0]  (!%p3599_p0), %s4025_s4, 4608, %s3586_s11, [#allocation9], %s3412_s6, %s3412_s6, %s3413_s21  }
  0x57   : > { %s233_s13 = scalar_lea.sflag [#allocation3], %s3500_s29  ;;  %s3274_s7 = scalar_lea.hbm %s3595_s17, 128 }
  0x58   : > { %p3275_p6 = scmp.ne.s32.totalorder %s3595_s17, %s3274_s7  ;;  %p4061_p8 = scmp.ne.s32.totalorder %s4053_s18, 0 }
  0x59   : > { %s3279_s30 = scalar_lea.hbm %s4021_s0, 256  ;;  %p3280_p5 = scmp.lt.u32.totalorder %s3595_s17, %s4021_s0 }
  0x5a   : > { %p3277_p3 = pnand %p3275_p6, %p4061_p8  ;;  %p3281_p7 = scmp.lt.u32.totalorder %s3279_s30, %s3274_s7 }
  0x5b   : > { %p3283_p10 = scmp.lt.u32.totalorder %s3274_s7, %s3595_s17 }
  0x5c   : > { %p3278_p1 = pneg %p3277_p3  ;;  %p3282_p11 = por %p3281_p7, %p3280_p5 }
  0x5e   : > { %p3284_p13 = por %p3283_p10, %p3282_p11 }
  0x60   : > { %p3285_p2 = pnand %p3284_p13, %p3278_p1 }
  0x62   : > { %3288 = shalt.err (!%p3285_p2)
}
  0x63   : > { %s3289_s29 = scalar_lea.vmem %s3605_s28, 128  ;;  %s3414_s11 = smov [#allocation2]  }
  0x64   : > { %p3290_p0 = scmp.ne.s32.totalorder %s3605_s28, %s3289_s29  ;;  %s3294_s27 = sshll.u32 %s3414_s11, 4  ;;  %s3295_s27 = int_to_ptr.vmem [resolvable:$false] %s3294_s27 }
  0x65   : > { %s3296_s24 = scalar_lea.vmem %s3295_s27, 256  ;;  %p3297_p12 = scmp.lt.s32.totalorder %s3605_s28, %s3295_s27 }
  0x66   : > { %p3292_p4 = pnand %p3290_p0, %p4061_p8  ;;  %p3298_p6 = scmp.lt.s32.totalorder %s3296_s24, %s3289_s29 }
  0x68   : > { %p3293_p9 = pneg %p3292_p4  ;;  %p3299_p3 = por %p3298_p6, %p3297_p12 }
  0x6a   : > { %p3300_p5 = pnand %p3299_p3, %p3293_p9 }
  0x6c   : > { %3303 = shalt.err (!%p3300_p5)
}
  0x6d   : > { %p4062_p1 = scmp.ne.s32.totalorder %s4051_s8, 0  ;;  %s3304_s25 = scalar_lea.hbm %s3611_s15, 256 }
  0x6e   : > { %p3305_p7 = scmp.ne.s32.totalorder %s3611_s15, %s3304_s25  ;;  %s3309_s19 = scalar_lea.hbm %s4023_s2, 512 }
  0x6f   : > { %3083 = dma.hbm_to_vmem [thread:$0]  (!%p4062_p1), %s3595_s17, 128, %s3605_s28, %s233_s13  }
  0x70   : > { %p3307_p11 = pnand %p3305_p7, %p4061_p8  ;;  %p3310_p13 = scmp.lt.u32.totalorder %s3611_s15, %s4023_s2 }
  0x71   : > { %p3311_p2 = scmp.lt.u32.totalorder %s3309_s19, %s3304_s25  ;;  %p3313_p4 = scmp.lt.u32.totalorder %s3304_s25, %s3611_s15 }
  0x72   : > { %p3308_p10 = pneg %p3307_p11 }
  0x73   : > { %p3312_p0 = por %p3311_p2, %p3310_p13 }
  0x75   : > { %p3314_p9 = por %p3313_p4, %p3312_p0 }
  0x77   : > { %p3315_p12 = pnand %p3314_p9, %p3308_p10 }
  0x79   : > { %3318 = shalt.err (!%p3315_p12)
}
  0x7a   : > { %s3319_s28 = scalar_lea.vmem %s3553_s20, 256  ;;  %s3415_s17 = smov [#allocation7]  }
  0x7b   : > { %p3320_p6 = scmp.ne.s32.totalorder %s3553_s20, %s3319_s28  ;;  %s3324_s13 = sshll.u32 %s3415_s17, 4  ;;  %s3325_s13 = int_to_ptr.vmem [resolvable:$false] %s3324_s13 }
  0x7c   : > { %s3326_s23 = scalar_lea.vmem %s3325_s13, 512  ;;  %p3327_p7 = scmp.lt.s32.totalorder %s3553_s20, %s3325_s13 }
  0x7d   : > { %p3322_p3 = pnand %p3320_p6, %p4061_p8  ;;  %p3328_p11 = scmp.lt.s32.totalorder %s3326_s23, %s3319_s28 }
  0x7f   : > { %p3323_p5 = pneg %p3322_p3  ;;  %p3329_p13 = por %p3328_p11, %p3327_p7 }
  0x81   : > { %p3330_p2 = pnand %p3329_p13, %p3323_p5 }
  0x83   : > { %3333 = shalt.err (!%p3330_p2)
}
  0x84   : > { %3089 = dma.hbm_to_vmem [thread:$0]  (!%p4062_p1), %s3611_s15, 256, %s3553_s20, %s3521_s16, %s3412_s6, %s3412_s6, %s3413_s21  }
  0x85   : > { %p4063_p8 = scmp.ne.s32.totalorder %s4059_s10, 0 }
  0x86   : > { %s3687_s18 = sand.u32 (!%p4063_p8), 1, %s3400_s22   ;;  %p4064_p10 = scmp.ne.s32.totalorder (!%p4063_p8), %s4054_s12, 0 }
  0x87   : > { %297 = sbr.rel (%p4063_p8) target bundleno = 4525 (0x11ad), region = 44  ;;  %s3690_s29 = sshll.u32 (!%p4063_p8), %s3687_s18, 3 }
  0x88   : > { %s300_s8 = scalar_lea.sflag (!%p4063_p8), [#allocation3], %s3687_s18  ;;  %s303_s11 = scalar_lea.vmem (!%p4063_p8), [#allocation2], %s3690_s29 }
  0x8e   : > { %3379 = dma.done.wait (%p4064_p10), %s300_s8, 128  }
  0x8f   : > { %3381 = vsyncadd (%p4064_p10), %s300_s8, 4294967168  ;;  %s308_s16 = sand.u32 1, %s3556_s26   ;;  %s312_s15 = scalar_lea.vmem [#allocation5], %s3690_s29 }
  0x90   : > { %s309_s20 = scalar_lea.sflag [#allocation6], %s308_s16 }
  0x91   : > { %3383 = dma.done.wait (%p4064_p10), %s309_s20, 384  }
  0x92   : > { %3385 = vsyncadd (%p4064_p10), %s309_s20, 4294966912  ;;  %s2657_s10 = sshll.u32 %s3687_s18, 4  ;;  %p4065_p1 = scmp.eq.s32.totalorder %s3556_s26, 0 }
  0x93   : > { %s3705_s6 = scalar_lea.vmem [#allocation7], %s2657_s10 }
  0x94   : > { %3387 = dma.done.wait (%p4065_p1), [#allocation9], 4608   ;;  %p4066_p0 = pmov %p4065_p1 }
  0x95   : > { %v3416_v0 = vmov 0.0|0.0   ;;  %vm3417_vm0 = vmmov 0   ;;  %v3418_v1 = vmov 0.0   ;;  %v377_v2 = vld [vmem:[#allocation8] sm:$0xff]  ;;  %v378_v3 = vld [vmem:[#allocation8 + $0x8] sm:$0xff]  ;;  %v379_v4 = vld [vmem:[#allocation8 + $0x10] sm:$0xff]  ;;  %v381_v11 = vlaneseq }
  0x96   : > { %3389 = vsyncadd (%p4066_p0), [#allocation9], 4294962688  ;;  %2980 = vmatprep.subr.bf16.mxu1 %v3416_v0  ;;  %2796 = vmatprep.mubr.msk.f32.mxu1 %vm3417_vm0, %v3418_v1  ;;  %v2981_v5 = vpack.c.bf16 %v378_v3, %v377_v2  ;;  %v380_v6 = vld [vmem:[#allocation8 + $0x18] sm:$0xff]  ;;  %v3717_v8 = vld [vmem:[%s303_s11] sm:$0xff]  ;;  %vm385_vm1 = vcmask 261120   ;;  %s3419_s27 = smov 104  }
  0x97   : > { %2810 = vmatprep.subr.mxu0 %v3418_v1  ;;  %2812 = vmatprep.mubr.msk.f32.mxu0 %vm3417_vm0, %v3418_v1  ;;  %v2984_v7 = vpack.c.bf16 %v380_v6, %v379_v4  ;;  %v3719_v9 = vld [vmem:[%s312_s15] sm:$0xff]  ;;  %v3728_v12 = vshrl.u32 %v381_v11, 7  ;;  %v3734_v14 = vld [vmem:[%s4026_s5] sm:$0xff]  ;;  %v460_v17 = vld [vmem:[#allocation8 + $0x28] sm:$0xff]  ;;  %s3420_s24 = smov 120   ;;  %s3421_s25 = smov 96  }
  0x98   : > { %2982 = vmatpush3.bf16.msra.mxu1 %v2981_v5  ;;  %v376_v10 = vadd.f32 %v3719_v9, %v3717_v8  ;;  %v459_v16 = vld [vmem:[#allocation8 + $0x20] sm:$0xff]  ;;  %v461_v18 = vld [vmem:[#allocation8 + $0x30] sm:$0xff]  ;;  %v462_v20 = vld [vmem:[#allocation8 + $0x38] sm:$0xff]  ;;  %s3422_s9 = smov 112   ;;  %vm559_vm2 = vcmask 64512   ;;  %s3423_s7 = smov 8  }
  0x99   : > { %2983 = vmatprep.subr.bf16.mxu1 %v3416_v0  ;;  %v383_v13 = vsub.s32 0, %v3728_v12  ;;  %v2987_v19 = vpack.c.bf16 %v460_v17, %v459_v16  ;;  %v2990_v22 = vpack.c.bf16 %v462_v20, %v461_v18  ;;  %v465_v31 = vsub.s32 1, %v3728_v12  ;;  %s3424_s19 = smov 16   ;;  %s3425_s1 = smov 24   ;;  %vm3848_vm5 = vmpackc.low %vm559_vm2, %vm559_vm2 }
  0x9a   : > { %vm1211_vm3 = vcmask 130048   ;;  %vm1213_vm4 = vcmask 195584   ;;  %p367_p4 = scmp.lt.s32.totalorder %s3556_s26, 1  ;;  %vm2398_vm6 = vcmask 523264   ;;  %s2699_s11 = sshll.u32 %s3556_s26, 7 }
  0x9b   : > { %v384_v15 = vrot.slane %v3734_v14, %v383_v13  ;;  %v466_v33 = vrot.slane %v3734_v14, %v465_v31  ;;  %s366_s16 = scalar_lea.vmem [#allocation10], %s3690_s29  ;;  %s2498_s21 = scalar_lea.sflag [#allocation4], %s3687_s18 }
  0x9c   : > { %2985 = vmatpush3.bf16.msra.mxu1 %v2984_v7  ;;  %s368_s17 = scalar_select %p367_p4, %s3556_s26, 1 }
  0x9d   : > { %2986 = vmatprep.subr.bf16.mxu1 %v3416_v0  ;;  %s2511_s20 = sshll.u32 %s366_s16, 4  ;;  %p4070_p12 = scmp.ne.s32.totalorder %s4056_s14, 0  ;;  %s3978_s20 = int_to_ptr.vmem [resolvable:$true] %s2511_s20 }
  0x9e   : > { %s369_s8 = scalar_lea.vmem %s4024_s3, %s368_s17  ;;  %s3426_s26 = smov [#allocation10]  }
  0x9f   : > { %2797 = vmatmul.mubr.msk.f32.vlgmr.msra.gmra.mrb[0].mxu1 %vm385_vm1, %v376_v10  ;;  %s3338_s29 = sshll.u32 %s3426_s26, 4  ;;  %s3339_s29 = int_to_ptr.vmem [resolvable:$false] %s3338_s29 }
  0xa0   : > { %2807 = vmatprep.mubr.msk.f32.mxu1 %vm3417_vm0, %v3418_v1  ;;  %2988 = vmatpush3.bf16.msra.mxu1 %v2987_v19  ;;  %p3341_p5 = scmp.lt.s32.totalorder %s3978_s20, %s3339_s29 }
  0xa1   : > { %2989 = vmatprep.subr.bf16.mxu1 %v3416_v0 }
  0xa4   : > { %2991 = vmatpush3.bf16.msra.mxu1 %v2990_v22 }
  0xa5   : > { %2815 = vmatprep.subr.mxu1 %v3418_v1 }
  0xa7   : > { %2808 = vmatmul.mubr.msk.f32.vlgmr.msra.gmra.mrb[2].mxu1 %vm385_vm1, %v3717_v8 }
  0xa8   : > { %2817 = vmatprep.mubr.msk.f32.mxu1 %vm3417_vm0, %v3418_v1 }
 0x172   : > { %v455_v21 = vpop.f32.mrb[0].mxu1 }
 0x173   : > { %v456_v23 = vadd.f32 %v455_v21, %v384_v15  ;;  %v2798_v24 = vpop.f32.mrb[1].mxu1 }
 0x175   : > { %545 = vrot.lane.b32.xlu1 %v456_v23, %s3419_s27  ;;  %541 = vrot.lane.b32.xlu0 %v456_v23, %s3420_s24 }
 0x179   : > { %557 = vrot.lane.b32.xlu1 %v456_v23, %s3421_s25  ;;  %543 = vrot.lane.b32.xlu0 %v456_v23, %s3422_s9 }
 0x17a   : > { %v536_v29 = vpop.f32.mrb[2].mxu1 }
 0x17b   : > { %v2809_v30 = vpop.f32.mrb[3].mxu1  ;;  %v537_v36 = vadd.f32 %v536_v29, %v466_v33  ;;  %v1215_v29 = vld [vmem:[#allocation8 + $0x40] sm:$0xff] }
 0x17c   : > { %v1216_v30 = vld [vmem:[#allocation8 + $0x48] sm:$0xff] }
 0x17d   : > { %v2993_v33 = vpack.c.bf16 %v1216_v30, %v1215_v29 }
 0x1e7   : > { %v546_v25 = vpop.permute.xlu1 %545  ;;  %v542_v26 = vpop.permute.xlu0 %541 }
 0x1e8   : > { %634 = vrot.lane.b32.xlu0 %v542_v26, %s3421_s25 }
 0x1eb   : > { %v558_v27 = vpop.permute.xlu1 %557  ;;  %v544_v28 = vpop.permute.xlu0 %543 }
 0x1ec   : > { %2811 = vmatpush3.xpose.msk.msra.mxu0 %vm559_vm2, %v558_v27  ;;  %786 = vrot.lane.b32.xlu0 %v546_v25, %s3421_s25 }
 0x1ed   : > { %710 = vrot.lane.b32.xlu1 %v544_v28, %s3421_s25  ;;  %2820 = vmatprep.subr.mxu0 %v3418_v1 }
 0x1ef   : > { %2813 = vmatmul.mubr.msk.f32.vlgmr.msra.gmra.mrb[0].mxu0 %vm559_vm2, %v456_v23 }
 0x1f0   : > { %2822 = vmatprep.mubr.msk.f32.mxu0 %vm3417_vm0, %v3418_v1 }
 0x25a   : > { %v635_v32 = vpop.permute.xlu0 %634 }
 0x25b   : > { %2816 = vmatpush3.xpose.msk.msra.mxu1 %vm559_vm2, %v635_v32  ;;  %v1217_v32 = vld [vmem:[#allocation8 + $0x50] sm:$0xff] }
 0x25c   : > { %2825 = vmatprep.subr.mxu1 %v3418_v1 }
 0x25e   : > { %2818 = vmatmul.mubr.msk.f32.vlgmr.msra.gmra.mrb[4].mxu1 %vm559_vm2, %v542_v26  ;;  %v787_v34 = vpop.permute.xlu0 %786 }
 0x25f   : > { %v711_v35 = vpop.permute.xlu1 %710  ;;  %2826 = vmatpush3.xpose.msk.msra.mxu1 %vm559_vm2, %v787_v34  ;;  %2827 = vmatprep.mubr.msk.f32.mxu1 %vm3417_vm0, %v3418_v1  ;;  %v1218_v34 = vld [vmem:[#allocation8 + $0x58] sm:$0xff] }
 0x260   : > { %2821 = vmatpush3.xpose.msk.msra.mxu0 %vm559_vm2, %v711_v35  ;;  %2835 = vmatprep.subr.mxu1 %v3418_v1  ;;  %v2996_v35 = vpack.c.bf16 %v1218_v34, %v1217_v32 }
 0x261   : > { %2830 = vmatprep.subr.mxu0 %v3418_v1 }
 0x262   : > { %2828 = vmatmul.mubr.msk.f32.vlgmr.msra.gmra.mrb[6].mxu1 %vm559_vm2, %v546_v25 }
 0x263   : > { %2823 = vmatmul.mubr.msk.f32.vlgmr.msra.gmra.mrb[2].mxu0 %vm559_vm2, %v544_v28  ;;  %2837 = vmatprep.mubr.msk.f32.mxu1 %vm3417_vm0, %v3418_v1 }
 0x264   : > { %2831 = vmatpush3.msra.mxu0 %v537_v36  ;;  %2832 = vmatprep.mubr.msk.f32.mxu0 %vm3417_vm0, %v3418_v1 }
 0x265   : > { %2840 = vmatprep.subr.mxu0 %v3418_v1 }
 0x2c2   : > { %v630_v37 = vpop.f32.mrb[0].mxu0 }
 0x2c3   : > { %v2814_v38 = vpop.f32.mrb[1].mxu0  ;;  %v862_v39 = vsel %vm559_vm2, %v630_v37, -inf }
 0x2c4   : > { %863 = vmax.xlane.f32.xlu1 %v862_v39 }
 0x331   : > { %v706_v40 = vpop.f32.mrb[4].mxu1 }
 0x332   : > { %v2819_v41 = vpop.f32.mrb[5].mxu1  ;;  %v865_v42 = vsel %vm559_vm2, %v706_v40, -inf }
 0x333   : > { %866 = vmax.xlane.f32.xlu0 %v865_v42 }
 0x335   : > { %v858_v43 = vpop.f32.mrb[6].mxu1 }
 0x336   : > { %v782_v44 = vpop.f32.mrb[2].mxu0  ;;  %v2829_v45 = vpop.f32.mrb[7].mxu1  ;;  %v871_v46 = vsel %vm559_vm2, %v858_v43, -inf }
 0x337   : > { %v2824_v47 = vpop.f32.mrb[3].mxu0  ;;  %v868_v48 = vsel %vm559_vm2, %v782_v44, -inf  ;;  %872 = vmax.xlane.f32.xlu1 %v871_v46 }
 0x338   : > { %869 = vmax.xlane.f32.xlu0 %v868_v48  ;;  %v1221_v48 = vsub.s32 2, %v3728_v12 }
 0x351   : > { %v864_v49 = vpop.xlane.xlu1 %863 }
 0x352   : > { %v874_v50 = vsub.f32 %v630_v37, %v864_v49  ;;  %v1222_v49 = vrot.slane %v3734_v14, %v1221_v48 }
 0x354   : > { %v878_v51 = vmul.f32 1.442695, %v874_v50 }
 0x356   : > { %3178 = vpow2.f32 %v878_v51 }
 0x360   : > { %v3179_v52 = vpop.eup %3178 }
 0x361   : > { %v886_v53 = vsel %vm559_vm2, %v3179_v52, 0.0 }
 0x362   : > { %887 = vadd.xlane.f32.xlu0 %v886_v53 }
 0x3c0   : > { %v867_v54 = vpop.xlane.xlu0 %866 }
 0x3c1   : > { %v875_v55 = vsub.f32 %v706_v40, %v867_v54 }
 0x3c3   : > { %v880_v56 = vmul.f32 1.442695, %v875_v55  ;;  %v1403_v55 = vld [vmem:[#allocation8 + $0x80] sm:$0xff] }
 0x3c4   : > { %v873_v2 = vpop.xlane.xlu1 %872 }
 0x3c5   : > { %3180 = vpow2.f32 %v880_v56  ;;  %v870_v57 = vpop.xlane.xlu0 %869  ;;  %v877_v4 = vsub.f32 %v858_v43, %v873_v2  ;;  %v1404_v56 = vld [vmem:[#allocation8 + $0x88] sm:$0xff]  ;;  %v1406_v2 = vld [vmem:[#allocation8 + $0x98] sm:$0xff] }
 0x3c6   : > { %v876_v58 = vsub.f32 %v782_v44, %v870_v57  ;;  %v3004_v57 = vpack.c.bf16 %v1404_v56, %v1403_v55  ;;  %v2678_v56 = vld [vmem:[%s369_s8] ss:$0 sm:$0xff] }
 0x3c7   : > { %v884_v5 = vmul.f32 1.442695, %v877_v4  ;;  %v375_v4 = vld [vmem:[%s3705_s6 + $0x8] sm:$0xff] }
 0x3c8   : > { %v882_v59 = vmul.f32 1.442695, %v876_v58 }
 0x3ca   : > { %3182 = vpow2.f32 %v882_v59 }
 0x3cf   : > { %v3181_v60 = vpop.eup %3180 }
 0x3d0   : > { %v889_v61 = vsel %vm559_vm2, %v3181_v60, 0.0 }
 0x3d1   : > { %890 = vadd.xlane.f32.xlu1 %v889_v61 }
 0x3d4   : > { %v3183_v62 = vpop.eup %3182 }
 0x3d5   : > { %v892_v63 = vsel %vm559_vm2, %v3183_v62, 0.0 }
 0x3d6   : > { %893 = vadd.xlane.f32.xlu0 %v892_v63  ;;  %v1405_v63 = vld [vmem:[#allocation8 + $0x90] sm:$0xff] }
 0x3e2   : > { %551 = vrot.lane.b32.xlu1 %v537_v36, %s3422_s9 }
 0x3ec   : > { %548 = vrot.lane.b32.xlu0 %v537_v36, %s3420_s24 }
 0x3ef   : > { %v888_v3 = vpop.xlane.xlu0 %887 }
 0x3f0   : > { %3184 = vrcp.f32 %v888_v3  ;;  %v374_v3 = vld [vmem:[%s3705_s6] sm:$0xff]  ;;  %s4069_s6 = sld [smem:[#allocation22_spill]] }
 0x3f1   : > { %3186 = vpow2.f32 %v884_v5  ;;  %v1322_v5 = vld [vmem:[#allocation8 + $0x60] sm:$0xff] }
 0x3f6   : > { %s3976_s12 = scalar_lea.hbm %s4069_s6, %s2699_s11 }
 0x3fa   : > { %v3185_v6 = vpop.eup %3184 }
 0x3fb   : > { %v902_v7 = vmul.f32 %v3185_v6, %v3179_v52  ;;  %v3187_v10 = vpop.eup %3186  ;;  %v1323_v6 = vld [vmem:[#allocation8 + $0x68] sm:$0xff] }
 0x3fc   : > { %v895_v11 = vsel %vm559_vm2, %v3187_v10, 0.0 }
 0x3fd   : > { %2833 = vmatmul.mubr.msk.f32.vlgmr.msra.gmra.mrb[4].mxu0 %vm559_vm2, %v902_v7  ;;  %v2999_v7 = vpack.c.bf16 %v1323_v6, %v1322_v5 }
 0x3fe   : > { %2842 = vmatprep.mubr.msk.f32.mxu0 %vm3417_vm0, %v3418_v1 }
 0x406   : > { %896 = vadd.xlane.f32.xlu1 %v895_v11  ;;  %v1325_v11 = vld [vmem:[#allocation8 + $0x78] sm:$0xff] }
 0x417   : > { %554 = vrot.lane.b32.xlu1 %v537_v36, %s3419_s27 }
 0x45e   : > { %v891_v15 = vpop.xlane.xlu1 %890 }
 0x45f   : > { %3188 = vrcp.f32 %v891_v15 }
 0x462   : > { %v552_v16 = vpop.permute.xlu1 %551 }
 0x463   : > { %v894_v17 = vpop.xlane.xlu0 %893  ;;  %2841 = vmatpush3.msra.mxu0 %v552_v16 }
 0x464   : > { %3190 = vrcp.f32 %v894_v17  ;;  %2992 = vmatprep.subr.bf16.mxu0 %v3416_v0 }
 0x467   : > { %v549_v18 = vpop.permute.xlu0 %548 }
 0x468   : > { %2836 = vmatpush3.msra.mxu1 %v549_v18 }
 0x469   : > { %v3189_v19 = vpop.eup %3188  ;;  %2845 = vmatprep.subr.mxu1 %v3418_v1 }
 0x46a   : > { %v903_v20 = vmul.f32 %v3189_v19, %v3181_v60  ;;  %v3828_v19 = vld [vmem:[%s4026_s5 + $0x8] sm:$0xff] }
 0x46c   : > { %2838 = vmatmul.mubr.msk.f32.vlgmr.msra.gmra.mrb[8].mxu1 %vm559_vm2, %v903_v20  ;;  %v1318_v20 = vsub.s32 3, %v3728_v12 }
 0x46d   : > { %2847 = vmatprep.mubr.msk.f32.mxu1 %vm3417_vm0, %v3418_v1 }
 0x46e   : > { %v3191_v21 = vpop.eup %3190 }
 0x46f   : > { %v904_v22 = vmul.f32 %v3191_v21, %v3183_v62  ;;  %v1314_v21 = vrot.slane %v3828_v19, %v1221_v48 }
 0x471   : > { %2843 = vmatmul.mubr.msk.f32.vlgmr.msra.gmra.mrb[6].mxu0 %vm559_vm2, %v904_v22 }
 0x472   : > { %2858 = vmatprep.mubr.msk.f32.mxu0 %vm3417_vm0, %v3418_v1  ;;  %2994 = vmatpush3.bf16.msra.mxu0 %v2993_v33 }
 0x473   : > { %2995 = vmatprep.subr.bf16.mxu0 %v3416_v0 }
 0x476   : > { %2997 = vmatpush3.bf16.msra.mxu0 %v2996_v35 }
 0x477   : > { %3005 = vmatprep.subr.bf16.mxu0 %v3004_v57 }
 0x493   : > { %v897_v23 = vpop.xlane.xlu1 %896 }
 0x494   : > { %3192 = vrcp.f32 %v897_v23 }
 0x497   : > { %v555_v24 = vpop.permute.xlu1 %554 }
 0x498   : > { %2846 = vmatpush3.msra.mxu1 %v555_v24  ;;  %v1319_v24 = vrot.slane %v3828_v19, %v1318_v20 }
 0x499   : > { %2998 = vmatprep.subr.bf16.mxu1 %v3416_v0 }
 0x49e   : > { %v3193_v25 = vpop.eup %3192 }
 0x49f   : > { %v905_v26 = vmul.f32 %v3193_v25, %v3187_v10  ;;  %v1324_v10 = vld [vmem:[#allocation8 + $0x70] sm:$0xff] }
 0x4a0   : > { %v3002_v15 = vpack.c.bf16 %v1325_v11, %v1324_v10 }
 0x4a1   : > { %2848 = vmatmul.mubr.msk.f32.vlgmr.msra.gmra.mrb[10].mxu1 %vm559_vm2, %v905_v26 }
 0x4a2   : > { %2869 = vmatprep.mubr.msk.f32.mxu1 %vm3417_vm0, %v3418_v1  ;;  %3000 = vmatpush3.bf16.msra.mxu1 %v2999_v7 }
 0x4a3   : > { %3001 = vmatprep.subr.bf16.mxu1 %v3416_v0 }
 0x4a6   : > { %3003 = vmatpush3.bf16.msra.mxu1 %v3002_v15 }
 0x4a7   : > { %3012 = vmatprep.subr.bf16.mxu1 %v3416_v0 }
 0x4d0   : > { %v975_v27 = vpop.f32.mrb[4].mxu0 }
 0x4d1   : > { %v2834_v28 = vpop.f32.mrb[5].mxu0 }
 0x4d2   : > { %v1409_v28 = vsub.s32 4, %v3728_v12 }
 0x4d4   : > { %v1410_v29 = vrot.slane %v3734_v14, %v1409_v28 }
 0x53f   : > { %v1048_v36 = vpop.f32.mrb[8].mxu1 }
 0x540   : > { %1199 = vrot.lane.b32.xlu0 %v1048_v36, %s3423_s7  ;;  %v2839_v37 = vpop.f32.mrb[9].mxu1 }
 0x544   : > { %v1121_v38 = vpop.f32.mrb[6].mxu0 }
 0x545   : > { %1203 = vrot.lane.b32.xlu1 %v1121_v38, %s3424_s19  ;;  %v2844_v39 = vpop.f32.mrb[7].mxu0 }
 0x574   : > { %v1194_v40 = vpop.f32.mrb[10].mxu1 }
 0x575   : > { %1207 = vrot.lane.b32.xlu0 %v1194_v40, %s3425_s1  ;;  %v2849_v41 = vpop.f32.mrb[11].mxu1 }
 0x5b2   : > { %v1200_v42 = vpop.permute.xlu0 %1199 }
 0x5b3   : > { %v1210_v44 = vsel %vm559_vm2, %v975_v27, %v1200_v42 }
 0x5b7   : > { %v1204_v43 = vpop.permute.xlu1 %1203 }
 0x5b8   : > { %v1212_v45 = vsel %vm1211_vm3, %v1210_v44, %v1204_v43 }
 0x5e7   : > { %v1208_v46 = vpop.permute.xlu0 %1207 }
 0x5e8   : > { %v1214_v47 = vsel %vm1213_vm4, %v1212_v45, %v1208_v46 }
 0x5e9   : > { %2859 = vmatmul.mubr.msk.f32.vlgmr.msra.gmra.mrb[8].mxu0 %vm385_vm1, %v1214_v47  ;;  %v1329_v47 = vrot.slane %v3734_v14, %v1318_v20 }
 0x5ea   : > { %3007 = vmatpush3.bf16.msra.mxu0 %v3004_v57  ;;  %2880 = vmatprep.mubr.msk.f32.mxu0 %vm385_vm1, %v374_v3 }
 0x6bc   : > { %v1292_v50 = vpop.f32.mrb[8].mxu0 }
 0x6bd   : > { %v1293_v51 = vadd.f32 %v1292_v50, %v1222_v49  ;;  %v2860_v52 = vpop.f32.mrb[9].mxu0 }
 0x6bf   : > { %v1296_v53 = vadd.f32 %v1293_v51, %v3717_v8  ;;  %v3008_v8 = vpack.c.bf16 %v1406_v2, %v1405_v63 }
 0x6c1   : > { %v1297_v54 = vsel %vm385_vm1, %v1296_v53, 0.0  ;;  %3009 = vmatprep.subr.bf16.mxu0 %v3008_v8 }
 0x6c2   : > { %1298 = vadd.xlane.f32.xlu1 %v1297_v54  ;;  %3011 = vmatpush3.bf16.msra.mxu0 %v3008_v8 }
 0x6c3   : > { %3016 = vmatprep.subr.bf16.mxu0 %v3416_v0 }
 0x6c5   : > { %2881 = vmatmul.mubr.msk.f32.vlgmr.msra.gmra.mrb[10].mxu0 %vm385_vm1, %v375_v4 }
 0x6c6   : > { %2894 = vmatprep.mubr.msk.f32.mxu0 %vm3417_vm0, %v3418_v1 }
 0x74f   : > { %v1299_v58 = vpop.xlane.xlu1 %1298 }
 0x750   : > { %v1301_v59 = vmul.f32 0.03125, %v1299_v58 }
 0x752   : > { %v1302_v60 = vsub.f32 %v1296_v53, %v1301_v59 }
 0x754   : > { %v1303_v61 = vmul.f32 %v1302_v60, %v1302_v60 }
 0x756   : > { %v1304_v62 = vsel %vm385_vm1, %v1303_v61, 0.0 }
 0x757   : > { %1305 = vadd.xlane.f32.xlu0 %v1304_v62 }
 0x798   : > { %v2882_v30 = vpop.f32.mrb[10].mxu0 }
 0x799   : > { %v1489_v32 = vadd.f32 %v2882_v30, %v1410_v29  ;;  %v1483_v33 = vpop.f32.mrb[11].mxu0 }
 0x79a   : > { %v1484_v34 = vadd.f32 %v1483_v33, %v1410_v29 }
 0x79c   : > { %v3844_v35 = vpack.i.bf16 %v1489_v32, %v1484_v34  ;;  %v3013_v36 = vpack.c.bf16 %v1489_v32, %v1484_v34 }
 0x79e   : > { %3149 = vrot.lane.b32.xlu1 %v3844_v35, %s3422_s9  ;;  %3144 = vrot.lane.b32.xlu0 %v3844_v35, %s3420_s24 }
 0x7a2   : > { %3154 = vrot.lane.b32.xlu1 %v3844_v35, %s3419_s27 }
 0x7e4   : > { %v1306_v16 = vpop.xlane.xlu0 %1305 }
 0x7e5   : > { %v1307_v17 = vmul.f32 0.03125, %v1306_v16 }
 0x7e7   : > { %v1308_v18 = vadd.f32 1e-05, %v1307_v17 }
 0x7e9   : > { %3194 = vrsqrt.f32 %v1308_v18 }
 0x7f3   : > { %v3195_v22 = vpop.eup %3194 }
 0x7f4   : > { %v1310_v23 = vmul.f32 %v3195_v22, %v1302_v60 }
 0x7f6   : > { %v1315_v25 = vmul.f32 %v1314_v21, %v1310_v23 }
 0x7f8   : > { %v3833_v26 = vadd.f32 %v1319_v24, %v1315_v25 }
 0x7fa   : > { %v1321_v27 = vadd.f32 %v3833_v26, %v3719_v9 }
 0x7fc   : > { %2870 = vmatmul.mubr.msk.f32.vlgmr.msra.gmra.mrb[12].mxu1 %vm385_vm1, %v1321_v27 }
 0x7fd   : > { %2887 = vmatprep.mubr.msk.f32.mxu1 %vm3417_vm0, %v3418_v1  ;;  %3015 = vmatpush3.bf16.xpose.msk.msra.mxu1 %vm3848_vm5, %v3013_v36 }
 0x7fe   : > { %3020 = vmatprep.subr.bf16.mxu1 %v3416_v0 }
 0x810   : > { %v3861_v37 = vpop.permute.xlu1 %3149  ;;  %v3145_v38 = vpop.permute.xlu0 %3144 }
 0x811   : > { %v3152_v39 = vunpack.i.h.bf16 %v3861_v37  ;;  %v3151_v40 = vunpack.i.l.bf16 %v3861_v37  ;;  %v3147_v41 = vunpack.i.h.bf16 %v3145_v38  ;;  %v3146_v42 = vunpack.i.l.bf16 %v3145_v38 }
 0x813   : > { %v3017_v43 = vpack.c.bf16 %v3147_v41, %v3146_v42  ;;  %v3021_v51 = vpack.c.bf16 %v3152_v39, %v3151_v40 }
 0x814   : > { %v3865_v44 = vpop.permute.xlu1 %3154 }
 0x815   : > { %v3157_v45 = vunpack.i.h.bf16 %v3865_v44  ;;  %v3156_v46 = vunpack.i.l.bf16 %v3865_v44  ;;  %3019 = vmatpush3.bf16.xpose.msk.msra.mxu0 %vm3848_vm5, %v3017_v43 }
 0x816   : > { %3024 = vmatprep.subr.bf16.mxu0 %v3416_v0 }
 0x817   : > { %v3025_v52 = vpack.c.bf16 %v3157_v45, %v3156_v46 }
 0x8cf   : > { %v1399_v48 = vpop.f32.mrb[12].mxu1 }
 0x8d0   : > { %v1400_v49 = vadd.f32 %v1399_v48, %v1329_v47  ;;  %v2871_v50 = vpop.f32.mrb[13].mxu1 }
 0x8d2   : > { %1495 = vrot.lane.b32.xlu1 %v1400_v49, %s3422_s9  ;;  %1493 = vrot.lane.b32.xlu0 %v1400_v49, %s3420_s24  ;;  %s3340_s24 = scalar_lea.vmem %s3339_s29, 256 }
 0x8d3   : > { %2888 = vmatmul.mubr.msk.f32.vlgmr.msra.gmra.mrb[14].mxu1 %vm559_vm2, %v1400_v49 }
 0x8d4   : > { %3023 = vmatpush3.bf16.xpose.msk.msra.mxu1 %vm3848_vm5, %v3021_v51  ;;  %2901 = vmatprep.mubr.msk.f32.mxu1 %vm3417_vm0, %v3418_v1 }
 0x8d5   : > { %3028 = vmatprep.subr.bf16.mxu1 %v3416_v0 }
 0x8d6   : > { %1497 = vrot.lane.b32.xlu0 %v1400_v49, %s3419_s27  ;;  %s3334_s27 = scalar_lea.vmem %s3978_s20, 128 }
 0x8d7   : > { %p3335_p9 = scmp.ne.s32.totalorder %s3978_s20, %s3334_s27  ;;  %p3342_p7 = scmp.lt.s32.totalorder %s3340_s24, %s3334_s27 }
 0x8d9   : > { %p3336_p6 = pnand %p3335_p9, %p4070_p12  ;;  %p3343_p11 = por %p3342_p7, %p3341_p5 }
 0x8db   : > { %p3337_p3 = pneg %p3336_p6 }
 0x8dd   : > { %p3344_p13 = pnand %p3343_p11, %p3337_p3 }
 0x944   : > { %v1496_v53 = vpop.permute.xlu1 %1495  ;;  %v1494_v54 = vpop.permute.xlu0 %1493 }
 0x945   : > { %2895 = vmatmul.mubr.msk.f32.vlgmr.msra.gmra.mrb[12].mxu0 %vm559_vm2, %v1494_v54  ;;  %2902 = vmatmul.mubr.msk.f32.vlgmr.msra.gmra.mrb[16].mxu1 %vm559_vm2, %v1496_v53 }
 0x946   : > { %3027 = vmatpush3.bf16.xpose.msk.msra.mxu0 %vm3848_vm5, %v3025_v52  ;;  %2908 = vmatprep.mubr.msk.f32.mxu0 %vm3417_vm0, %v3418_v1 }
 0x947   : > { %2915 = vmatprep.mubr.msk.f32.mxu1 %vm3417_vm0, %v3418_v1  ;;  %3034 = vmatprep.subr.bf16.mxu0 %v3416_v0 }
 0x948   : > { %v1498_v55 = vpop.permute.xlu0 %1497 }
 0x94d   : > { %2909 = vmatmul.mubr.msk.f32.vlgmr.msra.gmra.mrb[14].mxu0 %vm559_vm2, %v1498_v55 }
 0x94e   : > { %2929 = vmatprep.mubr.msk.f32.mxu0 %vm3417_vm0, %v3418_v1 }
 0x9a6   : > { %v1592_v57 = vpop.f32.mrb[14].mxu1 }
 0x9a7   : > { %v1593_v58 = vadd.f32 %v2678_v56, %v1592_v57  ;;  %v2889_v59 = vpop.f32.mrb[15].mxu1 }
 0x9a9   : > { %v1824_v60 = vsel %vm1211_vm3, %v1593_v58, -inf }
 0x9aa   : > { %1825 = vmax.xlane.f32.xlu1 %v1824_v60 }
 0xa18   : > { %v1668_v61 = vpop.f32.mrb[12].mxu0  ;;  %v1744_v62 = vpop.f32.mrb[16].mxu1 }
 0xa19   : > { %v1669_v63 = vadd.f32 %v2678_v56, %v1668_v61  ;;  %v2896_v2 = vpop.f32.mrb[13].mxu0  ;;  %v2903_v8 = vpop.f32.mrb[17].mxu1  ;;  %v1745_v3 = vadd.f32 %v2678_v56, %v1744_v62 }
 0xa1b   : > { %v1827_v4 = vsel %vm1211_vm3, %v1669_v63, -inf  ;;  %v1830_v5 = vsel %vm1211_vm3, %v1745_v3, -inf }
 0xa1c   : > { %1828 = vmax.xlane.f32.xlu0 %v1827_v4 }
 0xa20   : > { %v1820_v6 = vpop.f32.mrb[14].mxu0  ;;  %1831 = vmax.xlane.f32.xlu0 %v1830_v5  ;;  %v2199_v5 = vld [vmem:[#allocation8 + $0xa0] sm:$0xff] }
 0xa21   : > { %v1821_v7 = vadd.f32 %v2678_v56, %v1820_v6  ;;  %v2910_v10 = vpop.f32.mrb[15].mxu0  ;;  %v2200_v6 = vld [vmem:[#allocation8 + $0xa8] sm:$0xff] }
 0xa22   : > { %v2201_v10 = vld [vmem:[#allocation8 + $0xb0] sm:$0xff] }
 0xa23   : > { %v1833_v11 = vsel %vm1211_vm3, %v1821_v7, -inf }
 0xa24   : > { %1834 = vmax.xlane.f32.xlu1 %v1833_v11  ;;  %v2202_v11 = vld [vmem:[#allocation8 + $0xb8] sm:$0xff] }
 0xa35   : > { %3164 = vrot.lane.b32.xlu1 %v3145_v38, %s3421_s25 }
 0xa36   : > { %3159 = vrot.lane.b32.xlu0 %v3844_v35, %s3421_s25 }
 0xa37   : > { %v1826_v15 = vpop.xlane.xlu1 %1825 }
 0xa38   : > { %v1836_v16 = vsub.f32 %v1593_v58, %v1826_v15  ;;  %v3044_v15 = vpack.c.bf16 %v2202_v11, %v2201_v10 }
 0xa3a   : > { %v1840_v17 = vmul.f32 1.442695, %v1836_v16 }
 0xa3c   : > { %3196 = vpow2.f32 %v1840_v17 }
 0xa46   : > { %v3197_v18 = vpop.eup %3196 }
 0xa47   : > { %v1848_v20 = vsel %vm1211_vm3, %v3197_v18, 0.0 }
 0xa55   : > { %1849 = vadd.xlane.f32.xlu0 %v1848_v20 }
 0xaa9   : > { %v1829_v21 = vpop.xlane.xlu0 %1828 }
 0xaaa   : > { %v1837_v22 = vsub.f32 %v1669_v63, %v1829_v21 }
 0xaac   : > { %v1842_v23 = vmul.f32 1.442695, %v1837_v22 }
 0xaad   : > { %v1832_v24 = vpop.xlane.xlu0 %1831 }
 0xaae   : > { %3198 = vpow2.f32 %v1842_v23  ;;  %v1838_v25 = vsub.f32 %v1745_v3, %v1832_v24 }
 0xab0   : > { %v1844_v27 = vmul.f32 1.442695, %v1838_v25 }
 0xab1   : > { %v1835_v29 = vpop.xlane.xlu1 %1834  ;;  %v3160_v30 = vpop.permute.xlu0 %3159 }
 0xab2   : > { %3200 = vpow2.f32 %v1844_v27  ;;  %v1839_v32 = vsub.f32 %v1821_v7, %v1835_v29  ;;  %v3162_v33 = vunpack.i.h.bf16 %v3160_v30  ;;  %v3161_v34 = vunpack.i.l.bf16 %v3160_v30 }
 0xab3   : > { %v3041_v7 = vpack.c.bf16 %v2200_v6, %v2199_v5 }
 0xab4   : > { %v1846_v35 = vmul.f32 1.442695, %v1839_v32  ;;  %v3029_v36 = vpack.c.bf16 %v3162_v33, %v3161_v34  ;;  %v2205_v32 = vsub.s32 5, %v3728_v12 }
 0xab5   : > { %v3165_v45 = vpop.permute.xlu1 %3164 }
 0xab6   : > { %3202 = vpow2.f32 %v1846_v35  ;;  %3030 = vmatpush3.bf16.msra.mxu1 %v3029_v36  ;;  %v3167_v46 = vunpack.i.h.bf16 %v3165_v45  ;;  %v3166_v47 = vunpack.i.l.bf16 %v3165_v45  ;;  %v2206_v33 = vrot.slane %v3734_v14, %v2205_v32  ;;  %v2305_v45 = vld [vmem:[#allocation8 + $0xc8] sm:$0xff] }
 0xab7   : > { %3031 = vmatprep.subr.bf16.mxu1 %v3416_v0 }
 0xab8   : > { %v3199_v9 = vpop.eup %3198  ;;  %v3032_v50 = vpack.c.bf16 %v3167_v46, %v3166_v47  ;;  %v2306_v47 = vld [vmem:[#allocation8 + $0xd0] sm:$0xff] }
 0xab9   : > { %v1851_v38 = vsel %vm1211_vm3, %v3199_v9, 0.0 }
 0xaba   : > { %1852 = vadd.xlane.f32.xlu1 %v1851_v38 }
 0xabc   : > { %v3201_v39 = vpop.eup %3200 }
 0xabd   : > { %v1854_v40 = vsel %vm1211_vm3, %v3201_v39, 0.0 }
 0xabe   : > { %1855 = vadd.xlane.f32.xlu0 %v1854_v40 }
 0xac0   : > { %v3203_v41 = vpop.eup %3202 }
 0xac1   : > { %v1857_v42 = vsel %vm1211_vm3, %v3203_v41, 0.0 }
 0xac2   : > { %1858 = vadd.xlane.f32.xlu1 %v1857_v42 }
 0xad3   : > { %3169 = vrot.lane.b32.xlu1 %v3861_v37, %s3421_s25 }
 0xad4   : > { %3174 = vrot.lane.b32.xlu0 %v3865_v44, %s3421_s25 }
 0xae2   : > { %v1850_v43 = vpop.xlane.xlu0 %1849 }
 0xae3   : > { %3204 = vrcp.f32 %v1850_v43  ;;  %v2304_v43 = vld [vmem:[#allocation8 + $0xc0] sm:$0xff] }
 0xae4   : > { %v3047_v46 = vpack.c.bf16 %v2305_v45, %v2304_v43 }
 0xaed   : > { %v3205_v48 = vpop.eup %3204 }
 0xaee   : > { %v1864_v49 = vmul.f32 %v3205_v48, %v3197_v18  ;;  %v2307_v48 = vld [vmem:[#allocation8 + $0xd8] sm:$0xff] }
 0xaf0   : > { %2916 = vmatmul.mubr.msk.f32.vlgmr.msra.gmra.mrb[18].mxu1 %vm1211_vm3, %v1864_v49  ;;  %v3050_v49 = vpack.c.bf16 %v2307_v48, %v2306_v47 }
 0xaf1   : > { %3033 = vmatpush3.bf16.msra.mxu1 %v3032_v50  ;;  %2922 = vmatprep.mubr.msk.f32.mxu1 %vm3417_vm0, %v3418_v1  ;;  %v2387_v50 = vld [vmem:[#allocation8 + $0xe8] sm:$0xff] }
 0xaf2   : > { %3037 = vmatprep.subr.bf16.mxu1 %v3416_v0 }
 0xb47   : > { %v1853_v37 = vpop.xlane.xlu1 %1852 }
 0xb48   : > { %3206 = vrcp.f32 %v1853_v37  ;;  %v2388_v37 = vld [vmem:[#allocation8 + $0xf0] sm:$0xff] }
 0xb4b   : > { %v1856_v51 = vpop.xlane.xlu0 %1855 }
 0xb4c   : > { %3208 = vrcp.f32 %v1856_v51 }
 0xb4f   : > { %v1859_v44 = vpop.xlane.xlu1 %1858  ;;  %v3175_v52 = vpop.permute.xlu0 %3174 }
 0xb50   : > { %3210 = vrcp.f32 %v1859_v44  ;;  %v3177_v53 = vunpack.i.h.bf16 %v3175_v52  ;;  %v3176_v54 = vunpack.i.l.bf16 %v3175_v52  ;;  %v2389_v44 = vld [vmem:[#allocation8 + $0xf8] sm:$0xff] }
 0xb51   : > { %v3056_v52 = vpack.c.bf16 %v2389_v44, %v2388_v37 }
 0xb52   : > { %v3207_v55 = vpop.eup %3206  ;;  %v3038_v56 = vpack.c.bf16 %v3177_v53, %v3176_v54  ;;  %v2390_v53 = vld [vmem:[#allocation8 + $0x100] sm:$0xff]  ;;  %v2391_v54 = vld [vmem:[#allocation8 + $0x108] sm:$0xff] }
 0xb53   : > { %v1865_v57 = vmul.f32 %v3207_v55, %v3199_v9  ;;  %v3170_v58 = vpop.permute.xlu1 %3169  ;;  %v3059_v55 = vpack.c.bf16 %v2391_v54, %v2390_v53 }
 0xb54   : > { %v3172_v59 = vunpack.i.h.bf16 %v3170_v58  ;;  %v3171_v60 = vunpack.i.l.bf16 %v3170_v58 }
 0xb55   : > { %2923 = vmatmul.mubr.msk.f32.vlgmr.msra.gmra.mrb[20].mxu1 %vm1211_vm3, %v1865_v57 }
 0xb56   : > { %v3209_v61 = vpop.eup %3208  ;;  %v3035_v62 = vpack.c.bf16 %v3172_v59, %v3171_v60  ;;  %3039 = vmatpush3.bf16.msra.mxu1 %v3038_v56  ;;  %2936 = vmatprep.mubr.msk.f32.mxu1 %vm3417_vm0, %v3418_v1  ;;  %v2297_v59 = vrot.slane %v3828_v19, %v383_v13 }
 0xb57   : > { %v1866_v63 = vmul.f32 %v3209_v61, %v3201_v39  ;;  %3046 = vmatprep.subr.bf16.mxu1 %v3416_v0  ;;  %v2302_v61 = vrot.slane %v3828_v19, %v465_v31  ;;  %v2396_v31 = vsub.s32 7, %v3728_v12 }
 0xb58   : > { %3036 = vmatpush3.bf16.msra.mxu0 %v3035_v62 }
 0xb59   : > { %3040 = vmatprep.subr.bf16.mxu0 %v3416_v0  ;;  %v2397_v11 = vrot.slane %v3734_v14, %v2396_v31 }
 0xb5a   : > { %v3211_v2 = vpop.eup %3210 }
 0xb5b   : > { %v1867_v8 = vmul.f32 %v3211_v2, %v3203_v41  ;;  %2930 = vmatmul.mubr.msk.f32.vlgmr.msra.gmra.mrb[16].mxu0 %vm1211_vm3, %v1866_v63 }
 0xb5c   : > { %2947 = vmatprep.mubr.msk.f32.mxu0 %vm3417_vm0, %v3418_v1  ;;  %3042 = vmatpush3.bf16.msra.mxu0 %v3041_v7 }
 0xb5d   : > { %2937 = vmatmul.mubr.msk.f32.vlgmr.msra.gmra.mrb[22].mxu1 %vm1211_vm3, %v1867_v8  ;;  %3043 = vmatprep.subr.bf16.mxu0 %v3416_v0  ;;  %v2392_v8 = vld [vmem:[#allocation8 + $0x110] sm:$0xff] }
 0xb5e   : > { %2958 = vmatprep.mubr.msk.f32.mxu1 %vm3417_vm0, %v3418_v1  ;;  %3048 = vmatpush3.bf16.msra.mxu1 %v3047_v46 }
 0xb5f   : > { %3049 = vmatprep.subr.bf16.mxu1 %v3416_v0 }
 0xb60   : > { %3045 = vmatpush3.bf16.msra.mxu0 %v3044_v15 }
 0xb61   : > { %3052 = vmatprep.subr.bf16.mxu0 %v3416_v0 }
 0xb62   : > { %3051 = vmatpush3.bf16.msra.mxu1 %v3050_v49 }
 0xbc3   : > { %v1943_v3 = vpop.f32.mrb[18].mxu1 }
 0xbc4   : > { %v2917_v4 = vpop.f32.mrb[19].mxu1 }
 0xbc5   : > { %v2310_v4 = vsub.s32 6, %v3728_v12 }
 0xbc7   : > { %v2311_v5 = vrot.slane %v3734_v14, %v2310_v4 }
 0xc28   : > { %v2022_v16 = vpop.f32.mrb[20].mxu1 }
 0xc29   : > { %2185 = vrot.lane.b32.xlu1 %v2022_v16, %s3423_s7  ;;  %v2924_v17 = vpop.f32.mrb[21].mxu1 }
 0xc2e   : > { %v2101_v18 = vpop.f32.mrb[16].mxu0 }
 0xc2f   : > { %2189 = vrot.lane.b32.xlu0 %v2101_v18, %s3424_s19  ;;  %v2931_v20 = vpop.f32.mrb[17].mxu0 }
 0xc30   : > { %v2180_v21 = vpop.f32.mrb[22].mxu1 }
 0xc31   : > { %2193 = vrot.lane.b32.xlu1 %v2180_v21, %s3425_s1  ;;  %v2938_v22 = vpop.f32.mrb[23].mxu1 }
 0xc9b   : > { %v2186_v23 = vpop.permute.xlu1 %2185 }
 0xc9c   : > { %v2196_v24 = vsel %vm559_vm2, %v1943_v3, %v2186_v23 }
 0xca1   : > { %v2190_v25 = vpop.permute.xlu0 %2189 }
 0xca2   : > { %v2197_v27 = vsel %vm1211_vm3, %v2196_v24, %v2190_v25 }
 0xca3   : > { %v2194_v29 = vpop.permute.xlu1 %2193 }
 0xca4   : > { %v2198_v30 = vsel %vm1213_vm4, %v2197_v27, %v2194_v29 }
 0xca5   : > { %2948 = vmatmul.mubr.msk.f32.vlgmr.msra.gmra.mrb[18].mxu0 %vm385_vm1, %v2198_v30  ;;  %v2489_v30 = vrot.slane %v3828_v19, %v1409_v28 }
 0xca6   : > { %2977 = vmatprep.mubr.msk.f32.mxu0 %vm3417_vm0, %v3418_v1 }
 0xd78   : > { %v2276_v34 = vpop.f32.mrb[18].mxu0 }
 0xd79   : > { %v2277_v35 = vadd.f32 %v2276_v34, %v2206_v33  ;;  %v2949_v36 = vpop.f32.mrb[19].mxu0  ;;  %v2494_v34 = vrot.slane %v3828_v19, %v2205_v32 }
 0xd7b   : > { %v2280_v9 = vadd.f32 %v2277_v35, %v3833_v26  ;;  %v2386_v26 = vld [vmem:[#allocation8 + $0xe0] sm:$0xff] }
 0xd7c   : > { %v3053_v51 = vpack.c.bf16 %v2387_v50, %v2386_v26 }
 0xd7d   : > { %v2281_v38 = vsel %vm385_vm1, %v2280_v9, 0.0 }
 0xd7e   : > { %2282 = vadd.xlane.f32.xlu0 %v2281_v38  ;;  %3054 = vmatpush3.bf16.msra.mxu0 %v3053_v51 }
 0xd7f   : > { %3055 = vmatprep.subr.bf16.mxu0 %v3416_v0 }
 0xd82   : > { %3057 = vmatpush3.bf16.msra.mxu0 %v3056_v52 }
 0xd83   : > { %3058 = vmatprep.subr.bf16.mxu0 %v3416_v0 }
 0xd86   : > { %3060 = vmatpush3.bf16.msra.mxu0 %v3059_v55 }
 0xd87   : > { %3061 = vmatprep.subr.bf16.mxu0 %v3416_v0  ;;  %v2393_v0 = vld [vmem:[#allocation8 + $0x118] sm:$0xff] }
 0xd88   : > { %v3062_v3 = vpack.c.bf16 %v2393_v0, %v2392_v8 }
 0xd8a   : > { %3063 = vmatpush3.bf16.msra.mxu0 %v3062_v3 }
 0xe0b   : > { %v2283_v39 = vpop.xlane.xlu0 %2282 }
 0xe0c   : > { %v2284_v40 = vmul.f32 0.03125, %v2283_v39 }
 0xe0e   : > { %v2285_v41 = vsub.f32 %v2280_v9, %v2284_v40 }
 0xe10   : > { %v2286_v42 = vmul.f32 %v2285_v41, %v2285_v41 }
 0xe12   : > { %v2287_v1 = vsel %vm385_vm1, %v2286_v42, 0.0 }
 0xe13   : > { %2288 = vadd.xlane.f32.xlu1 %v2287_v1 }
 0xea0   : > { %v2289_v56 = vpop.xlane.xlu1 %2288 }
 0xea1   : > { %v2290_v57 = vmul.f32 0.03125, %v2289_v56 }
 0xea3   : > { %v2291_v58 = vadd.f32 1e-05, %v2290_v57 }
 0xea5   : > { %3212 = vrsqrt.f32 %v2291_v58 }
 0xeaf   : > { %v3213_v60 = vpop.eup %3212 }
 0xeb0   : > { %v2293_v62 = vmul.f32 %v3213_v60, %v2285_v41 }
 0xeb2   : > { %v2298_v63 = vmul.f32 %v2297_v59, %v2293_v62 }
 0xeb4   : > { %v2303_v2 = vadd.f32 %v2302_v61, %v2298_v63 }
 0xeb6   : > { %2959 = vmatmul.mubr.msk.f32.vlgmr.msra.gmra.mrb[24].mxu1 %vm385_vm1, %v2303_v2 }
 0xf89   : > { %v2381_v6 = vpop.f32.mrb[24].mxu1 }
 0xf8a   : > { %v2382_v13 = vadd.f32 %v2381_v6, %v2311_v5  ;;  %v2960_v7 = vpop.f32.mrb[25].mxu1 }
 0xf8c   : > { %v2385_v10 = vmax.f32 %v2382_v13, 0.0 }
 0xf8e   : > { %2978 = vmatmul.mubr.msk.f32.vlgmr.msra.gmra.mrb[20].mxu0 %vm2398_vm6, %v2385_v10 }
0x1061   : > { %v2468_v15 = vpop.f32.mrb[20].mxu0 }
0x1062   : > { %v2469_v16 = vadd.f32 %v2468_v15, %v2397_v11  ;;  %v2979_v17 = vpop.f32.mrb[21].mxu0 }
0x1064   : > { %v2472_v18 = vadd.f32 %v2469_v16, %v2303_v2 }
0x1066   : > { %v2473_v20 = vsel %vm385_vm1, %v2472_v18, 0.0 }
0x1067   : > { %2474 = vadd.xlane.f32.xlu0 %v2473_v20 }
0x10f4   : > { %v2475_v21 = vpop.xlane.xlu0 %2474 }
0x10f5   : > { %v2476_v22 = vmul.f32 0.03125, %v2475_v21 }
0x10f7   : > { %v2477_v23 = vsub.f32 %v2472_v18, %v2476_v22 }
0x10f9   : > { %v2478_v24 = vmul.f32 %v2477_v23, %v2477_v23 }
0x10fb   : > { %v2479_v25 = vsel %vm385_vm1, %v2478_v24, 0.0 }
0x10fc   : > { %2480 = vadd.xlane.f32.xlu0 %v2479_v25 }
0x1189   : > { %v2481_v27 = vpop.xlane.xlu0 %2480 }
0x118a   : > { %v2482_v29 = vmul.f32 0.03125, %v2481_v27 }
0x118c   : > { %v2483_v14 = vadd.f32 1e-05, %v2482_v29 }
0x118e   : > { %3214 = vrsqrt.f32 %v2483_v14 }
0x1198   : > { %v3215_v33 = vpop.eup %3214 }
0x1199   : > { %v2485_v35 = vmul.f32 %v3215_v33, %v2477_v23 }
0x119b   : > { %v2490_v36 = vmul.f32 %v2489_v30, %v2485_v35 }
0x119d   : > { %v2495_v9 = vadd.f32 %v2494_v34, %v2490_v36 }
0x119f   : > { %2496 = vst.msk [vmem:[%s366_s16] sm:$0xff] %vm385_vm1, %v2495_v9 }
0x11a0   : > { %3347 = shalt.err (!%p3344_p13)
}
0x11a1   : > { %s3348_s18 = scalar_lea.hbm %s3976_s12, 128  ;;  %s3352_s7 = scalar_lea.hbm %s4069_s6, 256 }
0x11a2   : > { %p3349_p2 = scmp.ne.s32.totalorder %s3976_s12, %s3348_s18  ;;  %p3353_p1 = scmp.lt.u32.totalorder %s3976_s12, %s4069_s6 }
0x11a3   : > { %p3354_p0 = scmp.lt.u32.totalorder %s3352_s7, %s3348_s18  ;;  %p3356_p9 = scmp.lt.u32.totalorder %s3348_s18, %s3976_s12 }
0x11a4   : > { %p3350_p8 = pnand %p3349_p2, %p4070_p12 }
0x11a5   : > { %p3355_p4 = por %p3354_p0, %p3353_p1 }
0x11a6   : > { %p3351_p10 = pneg %p3350_p8 }
0x11a7   : > { %p3357_p6 = por %p3356_p9, %p3355_p4 }
0x11a9   : > { %p3358_p3 = pnand %p3357_p6, %p3351_p10 }
0x11ab   : > { %3361 = shalt.err (!%p3358_p3)
}
0x11ac   : > { %3074 = dma.vmem_to_hbm [thread:$0]  (%p4070_p12), %s3978_s20, 128, %s3976_s12, %s2498_s21  }
0x11ad PF: > { %s4071_s30 = sld [smem:[#allocation15_spill]]  ;;  %s4072_s28 = sld [smem:[#allocation20_spill]] }
0x11ae   : > { %s4073_s17 = sld [smem:[#allocation17_spill]] }
0x11b3   : > { %s2523_s13 = sand.u32 1, %s4071_s30   ;;  %p4074_p5 = scmp.ne.s32.totalorder %s4072_s28, 0 }
0x11b4   : > { %p4075_p7 = scmp.ge.s32.totalorder %s4073_s17, 2  ;;  %s2524_s23 = scalar_lea.sflag [#allocation4], %s2523_s13 }
0x11b6   : > { %p3091_p11 = pnand %p4075_p7, %p4074_p5 }
0x11b8   : > { %3391 = dma.done.wait (!%p3091_p11), %s2524_s23, 128  }
0x11b9   : > { %3393 = vsyncadd (!%p3091_p11), %s2524_s23, 4294967168  ;;  %s4076_s24 = sld [smem:[#allocation18_spill]]  ;;  %s4077_s8 = sld [smem:[#allocation16_spill]] }
0x11ba   : > { %s4078_s23 = sld [smem:[#allocation19_spill]]  ;;  %s4079_s21 = smov %s3400_s22 }
0x11bf   : > { %p23_p13 = scmp.ge.s32.totalorder %s4076_s24, 4   ;;  %s4080_s22 = smov %s4077_s8 }
0x11c1   :  { %25 = sbr.rel (!%p23_p13) target bundleno = 11 (0xb), region = 120 }
0x11c8   :  { %2529 = vsyncpa [#allocation3], 1 }
0x11c9   :  { %2531 = vsyncpa [#allocation3 + $0x1], 1 }
0x11ca   :  { %2532 = vsyncpa [#allocation6], 1 }
0x11cb   :  { %2534 = vsyncpa [#allocation6 + $0x1], 1 }
0x11cc   :  { %2535 = vsyncpa [#allocation9], 1 }
0x11cd   :  { %2536 = vsyncpa [#allocation4], 1 }
0x11ce   :  { %2538 = vsyncpa [#allocation4 + $0x1], 1 }

</bundles_post_ra>
